<compile_context>
chip_gen: v7x
topology: tpu7x:2x2x1
jax: 0.10.0
libtpu: 0.0.40
codegen_flags: <defaults>
</compile_context>

<pallas_src>
import functools

import jax
import jax.numpy as jnp
from jax import lax
from jax.experimental import pallas as pl
from jax.experimental.pallas import tpu as pltpu


LANE = 128


# ------------------------------ small helpers ------------------------------ #

def _round_up(x, m):
    return ((x + m - 1) // m) * m


def _pad2(a, rows, cols):
    return jnp.pad(a, ((0, rows - a.shape[0]), (0, cols - a.shape[1])))


def _pad_cols(a, cols):
    return jnp.pad(a, ((0, 0), (0, cols - a.shape[1])))


def _infer_vmem_limit_bytes():
    """Generation-aware scoped-VMEM limit.

    v7x has only 64 MiB VMEM per TensorCore -> stay near 40 MiB scoped so the
    compiler keeps headroom for internal scratch; v5e/v6e have 128 MiB -> use
    ~100 MiB.  Falls back to a conservative value if the query fails.
    """
    try:
        cap = int(pltpu.get_tpu_info().vmem_capacity_bytes)
    except Exception:
        return 48 * 1024 * 1024
    if cap <= 64 * 1024 * 1024:
        return 40 * 1024 * 1024
    return 100 * 1024 * 1024


_VMEM_LIMIT = _infer_vmem_limit_bytes()


def _compiler_params(grid_rank):
    return pltpu.CompilerParams(
        dimension_semantics=("parallel",) * grid_rank,
        vmem_limit_bytes=_VMEM_LIMIT,
    )


def _pick_tile(m):
    """Pick an M tile (multiple of 128) and the padded M.

    Prefers >= 4 grid steps (keeps both v7x TensorCores fed and the 2-deep
    pipeline busy), then >= 2, then 1.  Among admissible tiles it prefers the
    largest tile whose padding waste is small (<~8%), otherwise the tile with
    the least dead rows.  1024-row tiles are only considered when the VMEM
    budget is large (v5e/v6e).
    """
    cands = (1024, 512, 384, 256, 128) if _VMEM_LIMIT >= 64 * 1024 * 1024 \
        else (512, 384, 256, 128)
    for min_steps in (4, 2, 1):
        ok = []
        for tm in cands:
            mp = _round_up(m, tm)
            if mp // tm >= min_steps:
                ok.append((tm, mp, mp - m))
        if not ok:
            continue
        dense = [c for c in ok if c[2] * 12 <= c[1]]   # waste <= ~8.3%
        if dense:
            tm, mp, _ = max(dense, key=lambda c: c[0])
        else:
            tm, mp, _ = min(ok, key=lambda c: (c[2], -c[0]))
        return tm, mp
    return 128, _round_up(max(m, 1), 128)


def _const_spec(shape):
    """BlockSpec for a grid-invariant (constant index map) operand.

    Single-buffered: the default 2-deep pipeline would waste a second VMEM
    copy of a block that never changes.
    """
    nd = len(shape)
    return pl.BlockSpec(shape, lambda *idx: (0,) * nd,
                        pipeline_mode=pl.Buffered(1))


# ----------------------------- Pallas kernels ------------------------------ #

def _mm_bn_kernel(x_ref, w_ref, s_ref, b_ref, o_ref, *, relu):
    # bf16 MXU operands, f32 accumulation; BN scale/bias math in f32.
    y = jnp.dot(x_ref[...], w_ref[...], preferred_element_type=jnp.float32)
    y = y * s_ref[...] + b_ref[...]
    if relu:
        y = jnp.maximum(y, 0.0)
    o_ref[...] = y.astype(o_ref.dtype)


def _mm_bn_res_relu_kernel(x_ref, w_ref, s_ref, b_ref, r_ref, o_ref):
    # conv3 + bn3 + identity residual (bf16 in HBM, f32 add in-kernel) + relu.
    y = jnp.dot(x_ref[...], w_ref[...], preferred_element_type=jnp.float32)
    y = y * s_ref[...] + b_ref[...] + r_ref[...].astype(jnp.float32)
    o_ref[...] = jnp.maximum(y, 0.0).astype(o_ref.dtype)


def _mm_bn_shortcut_relu_kernel(x_ref, w_ref, s_ref, b_ref,
                                xs_ref, ws_ref, ss_ref, bs_ref, o_ref):
    # conv3 + bn3 and the projection shortcut (1x1 conv + bn) fused in one
    # kernel: the residual never round-trips through HBM.
    y = jnp.dot(x_ref[...], w_ref[...], preferred_element_type=jnp.float32)
    y = y * s_ref[...] + b_ref[...]
    r = jnp.dot(xs_ref[...], ws_ref[...], preferred_element_type=jnp.float32)
    r = r * ss_ref[...] + bs_ref[...]
    o_ref[...] = jnp.maximum(y + r, 0.0).astype(o_ref.dtype)


def _conv3x3_bn_relu_kernel(ph_ref, w_ref, s_ref, b_ref, o_ref, acc_ref,
                            *, stride, wreq, nrows):
    """Fused im2col 3x3 conv for one (image, row-tile).

    ph_ref : (stride*stride, rows_h*Wreq, Cp) phase-decomposed, row-flattened
             padded activation window (bf16), including an (off_max+1)-row
             halo.  Every tap (dy, dx) is a *contiguous* row window of one
             phase, so no strided / gathered access is needed inside the
             kernel.
    w_ref  : (9, Cp, Coutp) per-tap weights (bf16), tap index = dy*3 + dx.
    acc_ref: (nrows, Coutp) f32 VMEM accumulator (explicit, bounded by the
             row-tile choice in the wrapper).
    Output rows are in the "Wreq-wide" frame (columns >= Wo are garbage and
    are sliced away by the wrapper).
    """
    first = True
    for dy in range(3):
        for dx in range(3):
            p = (dy % stride) * stride + (dx % stride)
            off = (dy // stride) * wreq + (dx // stride)
            lhs = ph_ref[p, off:off + nrows, :]
            d = jnp.dot(lhs, w_ref[dy * 3 + dx],
                        preferred_element_type=jnp.float32)
            if first:
                acc_ref[...] = d
                first = False
            else:
                acc_ref[...] += d
    y = acc_ref[...] * s_ref[...] + b_ref[...]
    o_ref[...] = jnp.maximum(y, 0.0).astype(o_ref.dtype)


# ------------------------------ kernel wrappers ----------------------------- #

def matmul_bn(x, w, scale, bias, *, relu, out_dtype,
              residual=None, shortcut=None):
    """act((x @ w) * scale + bias [+ residual | + (xs @ ws) * ss + bs]).

    x: (M, K); w: (K, Cout).  MXU operands are cast to bf16, accumulation and
    BN/residual math are f32.  Channels are zero-padded to multiples of 128
    (lane-dense stores); M is padded to the tile multiple.  Returns
    (M, Cout_padded) in `out_dtype` — callers keep the padded channels for the
    next stage or slice them off at the end.
    """
    M, K = x.shape
    Cout = w.shape[1]
    Kp = _round_up(max(K, w.shape[0]), LANE)
    Cp = _round_up(Cout, LANE)
    tm, Mp = _pick_tile(M)

    args = [_pad2(x.astype(jnp.bfloat16), Mp, Kp),
            _pad2(w.astype(jnp.bfloat16), Kp, Cp),
            _pad_cols(scale.astype(jnp.float32).reshape(1, -1), Cp),
            _pad_cols(bias.astype(jnp.float32).reshape(1, -1), Cp)]
    in_specs = [pl.BlockSpec((tm, Kp), lambda i: (i, 0)),
                _const_spec((Kp, Cp)),
                _const_spec((1, Cp)),
                _const_spec((1, Cp))]

    if shortcut is not None:
        xs, ws, ss, bs = shortcut
        K2p = _round_up(max(xs.shape[1], ws.shape[0]), LANE)
        args += [_pad2(xs.astype(jnp.bfloat16), Mp, K2p),
                 _pad2(ws.astype(jnp.bfloat16), K2p, Cp),
                 _pad_cols(ss.astype(jnp.float32).reshape(1, -1), Cp),
                 _pad_cols(bs.astype(jnp.float32).reshape(1, -1), Cp)]
        in_specs += [pl.BlockSpec((tm, K2p), lambda i: (i, 0)),
                     _const_spec((K2p, Cp)),
                     _const_spec((1, Cp)),
                     _const_spec((1, Cp))]
        kernel = _mm_bn_shortcut_relu_kernel
    elif residual is not None:
        # Residual stays bf16 in HBM; the add happens in f32 inside the kernel.
        args.append(_pad2(residual.astype(jnp.bfloat16), Mp, Cp))
        in_specs.append(pl.BlockSpec((tm, Cp), lambda i: (i, 0)))
        kernel = _mm_bn_res_relu_kernel
    else:
        kernel = functools.partial(_mm_bn_kernel, relu=relu)

    out = pl.pallas_call(
        kernel,
        out_shape=jax.ShapeDtypeStruct((Mp, Cp), out_dtype),
        grid_spec=pltpu.PrefetchScalarGridSpec(
            num_scalar_prefetch=0,
            grid=(Mp // tm,),
            in_specs=in_specs,
            out_specs=pl.BlockSpec((tm, Cp), lambda i: (i, 0)),
        ),
        compiler_params=_compiler_params(1),
    )(*args)
    return out[:M]


def conv3x3_bn_relu(a1, w2, scale, bias, stride):
    """3x3 conv (padding=1, given stride) + BN + ReLU with im2col fused in-kernel.

    a1 : (N, H, W, Cp) bf16 activation; padded channels of a1 must be zero.
    w2 : (9, Cin, Cout) per-tap weights (tap index = dy*3 + dx).
    Returns ((N, Ho, Wo, Coutp) bf16, (Ho, Wo)).
    """
    N, H, W, Cp = a1.shape
    _, Cin, Cout = w2.shape
    Coutp = _round_up(Cout, LANE)
    s = int(stride)
    assert s in (1, 2), "phase/offset math assumes stride in {1, 2}"
    Ho = (H - 1) // s + 1
    Wo = (W - 1) // s + 1
    off_max = 2 // s                       # max (dy//s) == max (dx//s)

    # Sublane-friendly width: Wreq multiple of 8 so dx//s == 0 tap windows
    # start on an (8,128) boundary and output rows per tile stay 8-aligned.
    Wreq = _round_up(max(-(-(W + 2) // s), Wo + off_max), 8)

    # Row tiling: bound the f32 accumulator (th*Wreq, Coutp) to ~256 KiB so
    # per-step VMEM stays small on v7x and small-batch inputs still generate
    # several grid steps for megacore.
    acc_budget_rows = max(Wreq, (256 * 1024) // (Coutp * 4))
    th = max(1, min(Ho, acc_budget_rows // Wreq))
    T = -(-Ho // th)
    Hreq = T * th + off_max + 1            # phase rows needed (unflattened H)
    rows_h = th + off_max + 1              # phase rows per tile (incl. halo)
    nrows = th * Wreq                      # output rows per tile (Wreq frame)

    # Spatial pad (padding=1) then phase-decompose (space-to-depth) so every
    # 3x3 tap becomes a contiguous, unstrided window — one ~1x copy instead of
    # a 9x HBM im2col expansion.
    xp = jnp.pad(a1, ((0, 0), (1, 1), (1, 1), (0, 0)))
    phases = []
    for py in range(s):
        for px in range(s):
            phase = xp[:, py::s, px::s, :][:, :Hreq, :Wreq, :]
            phase = jnp.pad(phase, ((0, 0),
                                    (0, Hreq - phase.shape[1]),
                                    (0, Wreq - phase.shape[2]),
                                    (0, 0)))
            phases.append(phase)
    ph = jnp.stack(phases, axis=1)         # (N, s*s, Hreq, Wreq, Cp)

    # Per-tile row windows (small duplicated halo of off_max+1 rows) so kernel
    # blocks never overlap across grid steps.
    # TODO(synk): the halo duplication is done in JAX glue; an Element-indexed
    # overlapping BlockSpec could avoid the extra copy.
    if T == 1:
        pht = ph.reshape(N, 1, s * s, rows_h * Wreq, Cp)
    else:
        tiles = [ph[:, :, t * th: t * th + rows_h] for t in range(T)]
        pht = jnp.stack(tiles, axis=1).reshape(N, T, s * s, rows_h * Wreq, Cp)

    w2p = jnp.zeros((9, Cp, Coutp), jnp.bfloat16)
    w2p = w2p.at[:, :Cin, :Cout].set(w2.astype(jnp.bfloat16))
    sc = _pad_cols(scale.astype(jnp.float32).reshape(1, -1), Coutp)
    bi = _pad_cols(bias.astype(jnp.float32).reshape(1, -1), Coutp)

    kernel = functools.partial(_conv3x3_bn_relu_kernel,
                               stride=s, wreq=Wreq, nrows=nrows)
    out = pl.pallas_call(
        kernel,
        out_shape=jax.ShapeDtypeStruct((N, T, nrows, Coutp), jnp.bfloat16),
        grid_spec=pltpu.PrefetchScalarGridSpec(
            num_scalar_prefetch=0,
            grid=(N, T),
            in_specs=[
                pl.BlockSpec((None, None, s * s, rows_h * Wreq, Cp),
                             lambda n, t: (n, t, 0, 0, 0)),
                _const_spec((9, Cp, Coutp)),
                _const_spec((1, Coutp)),
                _const_spec((1, Coutp)),
            ],
            out_specs=pl.BlockSpec((None, None, nrows, Coutp),
                                   lambda n, t: (n, t, 0, 0)),
            scratch_shapes=[pltpu.VMEM((nrows, Coutp), jnp.float32)],
        ),
        compiler_params=_compiler_params(2),
    )(pht, w2p, sc, bi)

    out = out.reshape(N, T * th, Wreq, Coutp)[:, :Ho, :Wo, :]
    return out, (Ho, Wo)


# ------------------------------- forward pass ------------------------------- #

def bottleneck_forward(x_nchw, p, *, stride):
    """Forward pass of the Bottleneck block.  Input/output are NCHW (PyTorch)."""
    # Cast to bf16 BEFORE the NCHW->NHWC transpose: the transpose (and the
    # shortcut strided slice below) then move 2 bytes/elt instead of 4.
    x = jnp.transpose(x_nchw.astype(jnp.bfloat16), (0, 2, 3, 1))  # NHWC bf16
    N, H, W, Cin = x.shape
    planes = p["conv1_w"].shape[0]
    expp = p["conv3_w"].shape[0]

    # conv1 (1x1) + bn1 + relu  -> bf16, lane-padded channels kept for conv2
    w1 = jnp.transpose(p["conv1_w"][:, :, 0, 0], (1, 0))          # (Cin, planes)
    a1 = matmul_bn(x.reshape(N * H * W, Cin), w1,
                   p["bn1_scale"], p["bn1_bias"],
                   relu=True, out_dtype=jnp.bfloat16)             # (M, planes_p)
    a1 = a1.reshape(N, H, W, a1.shape[1])

    # conv2 (3x3, stride, pad=1) + bn2 + relu  -- im2col fused in the kernel
    w2 = jnp.transpose(p["conv2_w"], (2, 3, 1, 0)).reshape(9, planes, planes)
    a2, (Ho, Wo) = conv3x3_bn_relu(a1, w2, p["bn2_scale"], p["bn2_bias"], stride)
    M2 = N * Ho * Wo
    a2 = a2.reshape(M2, a2.shape[-1])                             # (M2, planes_p)

    # conv3 (1x1) + bn3 + shortcut + add + relu, fully fused in one kernel.
    # Output stays bf16; cast back to f32 only after the channel slice /
    # NCHW transpose (halves the stage-3 output write).
    w3 = jnp.transpose(p["conv3_w"][:, :, 0, 0], (1, 0))          # (planes, expp)
    if "sc_w" in p:
        # TODO(synk): the strided slice of x is done in JAX glue (bf16); it
        # could be folded into the kernel's DMA pattern to avoid one HBM copy.
        xs = x[:, ::stride, ::stride, :].reshape(M2, Cin)
        ws = jnp.transpose(p["sc_w"][:, :, 0, 0], (1, 0))         # (Cin, expp)
        out = matmul_bn(a2, w3, p["bn3_scale"], p["bn3_bias"],
                        relu=True, out_dtype=jnp.bfloat16,
                        shortcut=(xs, ws, p["sc_scale"], p["sc_bias"]))
    else:
        assert stride == 1 and Cin == expp, \
            "identity shortcut requires stride==1 and matching channels"
        res = x.reshape(M2, Cin)
        out = matmul_bn(a2, w3, p["bn3_scale"], p["bn3_bias"],
                        relu=True, out_dtype=jnp.bfloat16, residual=res)

    out = out[:, :expp].reshape(N, Ho, Wo, expp)
    return jnp.transpose(out, (0, 3, 1, 2)).astype(jnp.float32)   # back to NCHW


# --------------------------- parameter creation ----------------------------- #

def init_params(key, in_planes, planes, stride, expansion=4):
    eps = 1e-5
    keys = jax.random.split(key, 20)
    ki = iter(range(20))

    def bn(c):
        gamma = 1.0 + 0.1 * jax.random.normal(keys[next(ki)], (c,), jnp.float32)
        beta = 0.1 * jax.random.normal(keys[next(ki)], (c,), jnp.float32)
        mean = 0.1 * jax.random.normal(keys[next(ki)], (c,), jnp.float32)
        var = jax.random.uniform(keys[next(ki)], (c,), jnp.float32, 0.5, 1.5)
        scale = gamma / jnp.sqrt(var + eps)
        bias = beta - mean * scale
        return scale, bias

    p = {}
    p["conv1_w"] = 0.1 * jax.random.normal(keys[next(ki)], (planes, in_planes, 1, 1), jnp.float32)
    p["bn1_scale"], p["bn1_bias"] = bn(planes)
    p["conv2_w"] = 0.1 * jax.random.normal(keys[next(ki)], (planes, planes, 3, 3), jnp.float32)
    p["bn2_scale"], p["bn2_bias"] = bn(planes)
    p["conv3_w"] = 0.1 * jax.random.normal(keys[next(ki)], (expansion * planes, planes, 1, 1), jnp.float32)
    p["bn3_scale"], p["bn3_bias"] = bn(expansion * planes)
    if stride != 1 or in_planes != expansion * planes:
        p["sc_w"] = 0.1 * jax.random.normal(keys[next(ki)], (expansion * planes, in_planes, 1, 1), jnp.float32)
        p["sc_scale"], p["sc_bias"] = bn(expansion * planes)
    return p


# ------------------------- pure-JAX reference check ------------------------- #

def _bn_ref(x, scale, bias):
    return x * scale[None, :, None, None] + bias[None, :, None, None]


def reference_forward(x, p, stride):
    dn = ("NCHW", "OIHW", "NCHW")
    out = lax.conv_general_dilated(x, p["conv1_w"], (1, 1), "VALID", dimension_numbers=dn)
    out = jnp.maximum(_bn_ref(out, p["bn1_scale"], p["bn1_bias"]), 0.0)
    out = lax.conv_general_dilated(out, p["conv2_w"], (stride, stride), ((1, 1), (1, 1)), dimension_numbers=dn)
    out = jnp.maximum(_bn_ref(out, p["bn2_scale"], p["bn2_bias"]), 0.0)
    out = lax.conv_general_dilated(out, p["conv3_w"], (1, 1), "VALID", dimension_numbers=dn)
    out = _bn_ref(out, p["bn3_scale"], p["bn3_bias"])
    if "sc_w" in p:
        sc = lax.conv_general_dilated(x, p["sc_w"], (stride, stride), "VALID", dimension_numbers=dn)
        sc = _bn_ref(sc, p["sc_scale"], p["sc_bias"])
    else:
        sc = x
    return jnp.maximum(out + sc, 0.0)


# ----------------------------------- main ----------------------------------- #

if __name__ == "__main__":
    # Small shapes consistent with the module.  Config 1 exercises the
    # projection shortcut (stride=2); config 2 exercises the identity path.
    configs = [
        dict(batch=2, in_planes=16, planes=8, stride=2, spatial=16),
        dict(batch=2, in_planes=32, planes=8, stride=1, spatial=16),
    ]

    key = jax.random.PRNGKey(0)
    fwd = jax.jit(bottleneck_forward, static_argnames=("stride",))

    for cfg in configs:
        key, kx, kp = jax.random.split(key, 3)
        x = jax.random.normal(
            kx, (cfg["batch"], cfg["in_planes"], cfg["spatial"], cfg["spatial"]),
            jnp.float32)  # NCHW
        params = init_params(kp, cfg["in_planes"], cfg["planes"], cfg["stride"])

        out = jax.block_until_ready(fwd(x, params, stride=cfg["stride"]))
        ref = jax.block_until_ready(reference_forward(x, params, cfg["stride"]))

        so = cfg["spatial"] // cfg["stride"]
        assert out.shape == ref.shape == (cfg["batch"], 4 * cfg["planes"], so, so)
        max_err = float(jnp.max(jnp.abs(out - ref)))
        # bf16 MXU operands / bf16 inter-stage HBM (f32 accumulation) =>
        # loosened tolerance vs the f32 reference.
        assert jnp.allclose(out, ref, atol=5e-2, rtol=5e-2), max_err

    print("KERNEL_OK")
</pallas_src>

<mosaic_0001>
module attributes {stable_mosaic.version = 11 : i64} {
  func.func @_mm_bn_kernel(%arg0: i32, %arg1: memref<128x128xbf16, #tpu.memory_space<vmem>>, %arg2: memref<128x128xbf16, #tpu.memory_space<vmem>>, %arg3: memref<1x128xf32, #tpu.memory_space<vmem>>, %arg4: memref<1x128xf32, #tpu.memory_space<vmem>>, %arg5: memref<128x128xbf16, #tpu.memory_space<vmem>>) attributes {dimension_semantics = [#tpu.dimension_semantics<parallel>], iteration_bounds = array<i64: 4>, scalar_prefetch = 0 : i64, scratch_operands = 0 : i64, tpu.core_type = #tpu.core_type<tc>, window_params = [{transform_indices = @transform_0, window_bounds = array<i64: 128, 128>}, {pipeline_mode = #tpu.pipeline_mode<synchronous>, transform_indices = @transform_1, window_bounds = array<i64: 128, 128>}, {pipeline_mode = #tpu.pipeline_mode<synchronous>, transform_indices = @transform_2, window_bounds = array<i64: 1, 128>}, {pipeline_mode = #tpu.pipeline_mode<synchronous>, transform_indices = @transform_3, window_bounds = array<i64: 1, 128>}, {transform_indices = @transform_4, window_bounds = array<i64: 128, 128>}]} {
    %c0 = arith.constant 0 : index
    %c0_0 = arith.constant 0 : index
    %0 = vector.load %arg1[%c0, %c0_0] : memref<128x128xbf16, #tpu.memory_space<vmem>>, vector<128x128xbf16>
    %c0_1 = arith.constant 0 : index
    %c0_2 = arith.constant 0 : index
    %1 = vector.load %arg2[%c0_1, %c0_2] : memref<128x128xbf16, #tpu.memory_space<vmem>>, vector<128x128xbf16>
    %cst = arith.constant dense<0.000000e+00> : vector<128x128xf32>
    %2 = tpu.matmul %0, %1, %cst {dimension_numbers = #tpu.dot_dimension_numbers<[1], [0], [0], [1], [0, 0, 1, 1], [], []>} : vector<128x128xbf16>, vector<128x128xbf16>, vector<128x128xf32> -> vector<128x128xf32>
    %c0_3 = arith.constant 0 : index
    %c0_4 = arith.constant 0 : index
    %3 = vector.load %arg3[%c0_3, %c0_4] : memref<1x128xf32, #tpu.memory_space<vmem>>, vector<1x128xf32>
    %4 = vector.broadcast %3 : vector<1x128xf32> to vector<128x128xf32>
    %5 = arith.mulf %2, %4 : vector<128x128xf32>
    %c0_5 = arith.constant 0 : index
    %c0_6 = arith.constant 0 : index
    %6 = vector.load %arg4[%c0_5, %c0_6] : memref<1x128xf32, #tpu.memory_space<vmem>>, vector<1x128xf32>
    %7 = vector.broadcast %6 : vector<1x128xf32> to vector<128x128xf32>
    %8 = arith.addf %5, %7 : vector<128x128xf32>
    %cst_7 = arith.constant 0.000000e+00 : f32
    %9 = vector.broadcast %cst_7 : f32 to vector<128x128xf32>
    %10 = arith.maximumf %8, %9 : vector<128x128xf32>
    %11 = arith.truncf %10 : vector<128x128xf32> to vector<128x128xbf16>
    %c0_8 = arith.constant 0 : index
    %c0_9 = arith.constant 0 : index
    %12 = vector.load %arg5[%c0_8, %c0_9] : memref<128x128xbf16, #tpu.memory_space<vmem>>, vector<128x128xbf16>
    tpu.vector_store %arg5[%c0_8, %c0_9], %11 {strides = array<i32>} : memref<128x128xbf16, #tpu.memory_space<vmem>>, vector<128x128xbf16>,
    return
  }
  func.func @transform_0(%arg0: i32) -> (i32, i32) {
    %c0_i32 = arith.constant 0 : i32
    %c0_i32_0 = arith.constant 0 : i32
    return %arg0, %c0_i32 : i32, i32
  }
  func.func @transform_1(%arg0: i32) -> (i32, i32) {
    %c0_i32 = arith.constant 0 : i32
    %c0_i32_0 = arith.constant 0 : i32
    %c0_i32_1 = arith.constant 0 : i32
    return %c0_i32, %c0_i32_0 : i32, i32
  }
  func.func @transform_2(%arg0: i32) -> (i32, i32) {
    %c0_i32 = arith.constant 0 : i32
    %c0_i32_0 = arith.constant 0 : i32
    %c0_i32_1 = arith.constant 0 : i32
    return %c0_i32, %c0_i32_0 : i32, i32
  }
  func.func @transform_3(%arg0: i32) -> (i32, i32) {
    %c0_i32 = arith.constant 0 : i32
    %c0_i32_0 = arith.constant 0 : i32
    %c0_i32_1 = arith.constant 0 : i32
    return %c0_i32, %c0_i32_0 : i32, i32
  }
  func.func @transform_4(%arg0: i32) -> (i32, i32) {
    %c0_i32 = arith.constant 0 : i32
    %c0_i32_0 = arith.constant 0 : i32
    return %arg0, %c0_i32 : i32, i32
  }
}

module attributes {stable_mosaic.version = 11 : i64} {
  func.func @_mm_bn_shortcut_relu_kernel(%arg0: i32, %arg1: memref<128x128xbf16, #tpu.memory_space<vmem>>, %arg2: memref<128x128xbf16, #tpu.memory_space<vmem>>, %arg3: memref<1x128xf32, #tpu.memory_space<vmem>>, %arg4: memref<1x128xf32, #tpu.memory_space<vmem>>, %arg5: memref<128x128xbf16, #tpu.memory_space<vmem>>, %arg6: memref<128x128xbf16, #tpu.memory_space<vmem>>, %arg7: memref<1x128xf32, #tpu.memory_space<vmem>>, %arg8: memref<1x128xf32, #tpu.memory_space<vmem>>, %arg9: memref<128x128xbf16, #tpu.memory_space<vmem>>) attributes {dimension_semantics = [#tpu.dimension_semantics<parallel>], iteration_bounds = array<i64: 1>, scalar_prefetch = 0 : i64, scratch_operands = 0 : i64, tpu.core_type = #tpu.core_type<tc>, window_params = [{transform_indices = @transform_0, window_bounds = array<i64: 128, 128>}, {pipeline_mode = #tpu.pipeline_mode<synchronous>, transform_indices = @transform_1, window_bounds = array<i64: 128, 128>}, {pipeline_mode = #tpu.pipeline_mode<synchronous>, transform_indices = @transform_2, window_bounds = array<i64: 1, 128>}, {pipeline_mode = #tpu.pipeline_mode<synchronous>, transform_indices = @transform_3, window_bounds = array<i64: 1, 128>}, {transform_indices = @transform_4, window_bounds = array<i64: 128, 128>}, {pipeline_mode = #tpu.pipeline_mode<synchronous>, transform_indices = @transform_5, window_bounds = array<i64: 128, 128>}, {pipeline_mode = #tpu.pipeline_mode<synchronous>, transform_indices = @transform_6, window_bounds = array<i64: 1, 128>}, {pipeline_mode = #tpu.pipeline_mode<synchronous>, transform_indices = @transform_7, window_bounds = array<i64: 1, 128>}, {transform_indices = @transform_8, window_bounds = array<i64: 128, 128>}]} {
    %c0 = arith.constant 0 : index
    %c0_0 = arith.constant 0 : index
    %0 = vector.load %arg1[%c0, %c0_0] : memref<128x128xbf16, #tpu.memory_space<vmem>>, vector<128x128xbf16>
    %c0_1 = arith.constant 0 : index
    %c0_2 = arith.constant 0 : index
    %1 = vector.load %arg2[%c0_1, %c0_2] : memref<128x128xbf16, #tpu.memory_space<vmem>>, vector<128x128xbf16>
    %cst = arith.constant dense<0.000000e+00> : vector<128x128xf32>
    %2 = tpu.matmul %0, %1, %cst {dimension_numbers = #tpu.dot_dimension_numbers<[1], [0], [0], [1], [0, 0, 1, 1], [], []>} : vector<128x128xbf16>, vector<128x128xbf16>, vector<128x128xf32> -> vector<128x128xf32>
    %c0_3 = arith.constant 0 : index
    %c0_4 = arith.constant 0 : index
    %3 = vector.load %arg3[%c0_3, %c0_4] : memref<1x128xf32, #tpu.memory_space<vmem>>, vector<1x128xf32>
    %4 = vector.broadcast %3 : vector<1x128xf32> to vector<128x128xf32>
    %5 = arith.mulf %2, %4 : vector<128x128xf32>
    %c0_5 = arith.constant 0 : index
    %c0_6 = arith.constant 0 : index
    %6 = vector.load %arg4[%c0_5, %c0_6] : memref<1x128xf32, #tpu.memory_space<vmem>>, vector<1x128xf32>
    %7 = vector.broadcast %6 : vector<1x128xf32> to vector<128x128xf32>
    %8 = arith.addf %5, %7 : vector<128x128xf32>
    %c0_7 = arith.constant 0 : index
    %c0_8 = arith.constant 0 : index
    %9 = vector.load %arg5[%c0_7, %c0_8] : memref<128x128xbf16, #tpu.memory_space<vmem>>, vector<128x128xbf16>
    %c0_9 = arith.constant 0 : index
    %c0_10 = arith.constant 0 : index
    %10 = vector.load %arg6[%c0_9, %c0_10] : memref<128x128xbf16, #tpu.memory_space<vmem>>, vector<128x128xbf16>
    %cst_11 = arith.constant dense<0.000000e+00> : vector<128x128xf32>
    %11 = tpu.matmul %9, %10, %cst_11 {dimension_numbers = #tpu.dot_dimension_numbers<[1], [0], [0], [1], [0, 0, 1, 1], [], []>} : vector<128x128xbf16>, vector<128x128xbf16>, vector<128x128xf32> -> vector<128x128xf32>
    %c0_12 = arith.constant 0 : index
    %c0_13 = arith.constant 0 : index
    %12 = vector.load %arg7[%c0_12, %c0_13] : memref<1x128xf32, #tpu.memory_space<vmem>>, vector<1x128xf32>
    %13 = vector.broadcast %12 : vector<1x128xf32> to vector<128x128xf32>
    %14 = arith.mulf %11, %13 : vector<128x128xf32>
    %c0_14 = arith.constant 0 : index
    %c0_15 = arith.constant 0 : index
    %15 = vector.load %arg8[%c0_14, %c0_15] : memref<1x128xf32, #tpu.memory_space<vmem>>, vector<1x128xf32>
    %16 = vector.broadcast %15 : vector<1x128xf32> to vector<128x128xf32>
    %17 = arith.addf %14, %16 : vector<128x128xf32>
    %18 = arith.addf %8, %17 : vector<128x128xf32>
    %cst_16 = arith.constant 0.000000e+00 : f32
    %19 = vector.broadcast %cst_16 : f32 to vector<128x128xf32>
    %20 = arith.maximumf %18, %19 : vector<128x128xf32>
    %21 = arith.truncf %20 : vector<128x128xf32> to vector<128x128xbf16>
    %c0_17 = arith.constant 0 : index
    %c0_18 = arith.constant 0 : index
    %22 = vector.load %arg9[%c0_17, %c0_18] : memref<128x128xbf16, #tpu.memory_space<vmem>>, vector<128x128xbf16>
    tpu.vector_store %arg9[%c0_17, %c0_18], %21 {strides = array<i32>} : memref<128x128xbf16, #tpu.memory_space<vmem>>, vector<128x128xbf16>,
    return
  }
  func.func @transform_0(%arg0: i32) -> (i32, i32) {
    %c0_i32 = arith.constant 0 : i32
    %c0_i32_0 = arith.constant 0 : i32
    return %arg0, %c0_i32 : i32, i32
  }
  func.func @transform_1(%arg0: i32) -> (i32, i32) {
    %c0_i32 = arith.constant 0 : i32
    %c0_i32_0 = arith.constant 0 : i32
    %c0_i32_1 = arith.constant 0 : i32
    return %c0_i32, %c0_i32_0 : i32, i32
  }
  func.func @transform_2(%arg0: i32) -> (i32, i32) {
    %c0_i32 = arith.constant 0 : i32
    %c0_i32_0 = arith.constant 0 : i32
    %c0_i32_1 = arith.constant 0 : i32
    return %c0_i32, %c0_i32_0 : i32, i32
  }
  func.func @transform_3(%arg0: i32) -> (i32, i32) {
    %c0_i32 = arith.constant 0 : i32
    %c0_i32_0 = arith.constant 0 : i32
    %c0_i32_1 = arith.constant 0 : i32
    return %c0_i32, %c0_i32_0 : i32, i32
  }
  func.func @transform_4(%arg0: i32) -> (i32, i32) {
    %c0_i32 = arith.constant 0 : i32
    %c0_i32_0 = arith.constant 0 : i32
    return %arg0, %c0_i32 : i32, i32
  }
  func.func @transform_5(%arg0: i32) -> (i32, i32) {
    %c0_i32 = arith.constant 0 : i32
    %c0_i32_0 = arith.constant 0 : i32
    %c0_i32_1 = arith.constant 0 : i32
    return %c0_i32, %c0_i32_0 : i32, i32
  }
  func.func @transform_6(%arg0: i32) -> (i32, i32) {
    %c0_i32 = arith.constant 0 : i32
    %c0_i32_0 = arith.constant 0 : i32
    %c0_i32_1 = arith.constant 0 : i32
    return %c0_i32, %c0_i32_0 : i32, i32
  }
  func.func @transform_7(%arg0: i32) -> (i32, i32) {
    %c0_i32 = arith.constant 0 : i32
    %c0_i32_0 = arith.constant 0 : i32
    %c0_i32_1 = arith.constant 0 : i32
    return %c0_i32, %c0_i32_0 : i32, i32
  }
  func.func @transform_8(%arg0: i32) -> (i32, i32) {
    %c0_i32 = arith.constant 0 : i32
    %c0_i32_0 = arith.constant 0 : i32
    return %arg0, %c0_i32 : i32, i32
  }
}

module attributes {stable_mosaic.version = 11 : i64} {
  func.func @_conv3x3_bn_relu_kernel(%arg0: i32, %arg1: i32, %arg2: memref<1x1x4x160x128xbf16, #tpu.memory_space<vmem>>, %arg3: memref<9x128x128xbf16, #tpu.memory_space<vmem>>, %arg4: memref<1x128xf32, #tpu.memory_space<vmem>>, %arg5: memref<1x128xf32, #tpu.memory_space<vmem>>, %arg6: memref<1x1x128x128xbf16, #tpu.memory_space<vmem>>, %arg7: memref<128x128xf32, #tpu.memory_space<vmem>>) attributes {dimension_semantics = [#tpu.dimension_semantics<parallel>, #tpu.dimension_semantics<parallel>], iteration_bounds = array<i64: 2, 1>, scalar_prefetch = 0 : i64, scratch_operands = 1 : i64, tpu.core_type = #tpu.core_type<tc>, window_params = [{transform_indices = @transform_0, window_bounds = array<i64: 1, 1, 4, 160, 128>}, {pipeline_mode = #tpu.pipeline_mode<synchronous>, transform_indices = @transform_1, window_bounds = array<i64: 9, 128, 128>}, {pipeline_mode = #tpu.pipeline_mode<synchronous>, transform_indices = @transform_2, window_bounds = array<i64: 1, 128>}, {pipeline_mode = #tpu.pipeline_mode<synchronous>, transform_indices = @transform_3, window_bounds = array<i64: 1, 128>}, {transform_indices = @transform_4, window_bounds = array<i64: 1, 1, 128, 128>}]} {
    %c0 = arith.constant 0 : index
    %c0_0 = arith.constant 0 : index
    %c0_1 = arith.constant 0 : index
    %c0_2 = arith.constant 0 : index
    %c0_3 = arith.constant 0 : index
    %0 = vector.load %arg2[%c0, %c0_0, %c0_1, %c0_2, %c0_3] : memref<1x1x4x160x128xbf16, #tpu.memory_space<vmem>>, vector<1x1x1x128x128xbf16>
    %1 = vector.shape_cast %0 : vector<1x1x1x128x128xbf16> to vector<128x128xbf16>
    %c0_4 = arith.constant 0 : index
    %c0_5 = arith.constant 0 : index
    %c0_6 = arith.constant 0 : index
    %2 = vector.load %arg3[%c0_4, %c0_5, %c0_6] : memref<9x128x128xbf16, #tpu.memory_space<vmem>>, vector<1x128x128xbf16>
    %3 = vector.shape_cast %2 : vector<1x128x128xbf16> to vector<128x128xbf16>
    %cst = arith.constant dense<0.000000e+00> : vector<128x128xf32>
    %4 = tpu.matmul %1, %3, %cst {dimension_numbers = #tpu.dot_dimension_numbers<[1], [0], [0], [1], [0, 0, 1, 1], [], []>} : vector<128x128xbf16>, vector<128x128xbf16>, vector<128x128xf32> -> vector<128x128xf32>
    %c0_7 = arith.constant 0 : index
    %c0_8 = arith.constant 0 : index
    %5 = vector.load %arg7[%c0_7, %c0_8] : memref<128x128xf32, #tpu.memory_space<vmem>>, vector<128x128xf32>
    tpu.vector_store %arg7[%c0_7, %c0_8], %4 {strides = array<i32>} : memref<128x128xf32, #tpu.memory_space<vmem>>, vector<128x128xf32>,
    %c0_9 = arith.constant 0 : index
    %c0_10 = arith.constant 0 : index
    %c1 = arith.constant 1 : index
    %c0_11 = arith.constant 0 : index
    %c0_12 = arith.constant 0 : index
    %6 = vector.load %arg2[%c0_9, %c0_10, %c1, %c0_11, %c0_12] : memref<1x1x4x160x128xbf16, #tpu.memory_space<vmem>>, vector<1x1x1x128x128xbf16>
    %7 = vector.shape_cast %6 : vector<1x1x1x128x128xbf16> to vector<128x128xbf16>
    %c1_13 = arith.constant 1 : index
    %c0_14 = arith.constant 0 : index
    %c0_15 = arith.constant 0 : index
    %8 = vector.load %arg3[%c1_13, %c0_14, %c0_15] : memref<9x128x128xbf16, #tpu.memory_space<vmem>>, vector<1x128x128xbf16>
    %9 = vector.shape_cast %8 : vector<1x128x128xbf16> to vector<128x128xbf16>
    %cst_16 = arith.constant dense<0.000000e+00> : vector<128x128xf32>
    %10 = tpu.matmul %7, %9, %cst_16 {dimension_numbers = #tpu.dot_dimension_numbers<[1], [0], [0], [1], [0, 0, 1, 1], [], []>} : vector<128x128xbf16>, vector<128x128xbf16>, vector<128x128xf32> -> vector<128x128xf32>
    %c0_17 = arith.constant 0 : index
    %c0_18 = arith.constant 0 : index
    %11 = vector.load %arg7[%c0_17, %c0_18] : memref<128x128xf32, #tpu.memory_space<vmem>>, vector<128x128xf32>
    %12 = arith.addf %11, %10 : vector<128x128xf32>
    %c0_19 = arith.constant 0 : index
    %c0_20 = arith.constant 0 : index
    %13 = vector.load %arg7[%c0_19, %c0_20] : memref<128x128xf32, #tpu.memory_space<vmem>>, vector<128x128xf32>
    tpu.vector_store %arg7[%c0_19, %c0_20], %12 {strides = array<i32>} : memref<128x128xf32, #tpu.memory_space<vmem>>, vector<128x128xf32>,
    %c0_21 = arith.constant 0 : index
    %c0_22 = arith.constant 0 : index
    %c0_23 = arith.constant 0 : index
    %c1_24 = arith.constant 1 : index
    %c0_25 = arith.constant 0 : index
    %14 = vector.load %arg2[%c0_21, %c0_22, %c0_23, %c1_24, %c0_25] : memref<1x1x4x160x128xbf16, #tpu.memory_space<vmem>>, vector<1x1x1x128x128xbf16>
    %15 = vector.shape_cast %14 : vector<1x1x1x128x128xbf16> to vector<128x128xbf16>
    %c2 = arith.constant 2 : index
    %c0_26 = arith.constant 0 : index
    %c0_27 = arith.constant 0 : index
    %16 = vector.load %arg3[%c2, %c0_26, %c0_27] : memref<9x128x128xbf16, #tpu.memory_space<vmem>>, vector<1x128x128xbf16>
    %17 = vector.shape_cast %16 : vector<1x128x128xbf16> to vector<128x128xbf16>
    %cst_28 = arith.constant dense<0.000000e+00> : vector<128x128xf32>
    %18 = tpu.matmul %15, %17, %cst_28 {dimension_numbers = #tpu.dot_dimension_numbers<[1], [0], [0], [1], [0, 0, 1, 1], [], []>} : vector<128x128xbf16>, vector<128x128xbf16>, vector<128x128xf32> -> vector<128x128xf32>
    %c0_29 = arith.constant 0 : index
    %c0_30 = arith.constant 0 : index
    %19 = vector.load %arg7[%c0_29, %c0_30] : memref<128x128xf32, #tpu.memory_space<vmem>>, vector<128x128xf32>
    %20 = arith.addf %19, %18 : vector<128x128xf32>
    %c0_31 = arith.constant 0 : index
    %c0_32 = arith.constant 0 : index
    %21 = vector.load %arg7[%c0_31, %c0_32] : memref<128x128xf32, #tpu.memory_space<vmem>>, vector<128x128xf32>
    tpu.vector_store %arg7[%c0_31, %c0_32], %20 {strides = array<i32>} : memref<128x128xf32, #tpu.memory_space<vmem>>, vector<128x128xf32>,
    %c0_33 = arith.constant 0 : index
    %c0_34 = arith.constant 0 : index
    %c2_35 = arith.constant 2 : index
    %c0_36 = arith.constant 0 : index
    %c0_37 = arith.constant 0 : index
    %22 = vector.load %arg2[%c0_33, %c0_34, %c2_35, %c0_36, %c0_37] : memref<1x1x4x160x128xbf16, #tpu.memory_space<vmem>>, vector<1x1x1x128x128xbf16>
    %23 = vector.shape_cast %22 : vector<1x1x1x128x128xbf16> to vector<128x128xbf16>
    %c3 = arith.constant 3 : index
    %c0_38 = arith.constant 0 : index
    %c0_39 = arith.constant 0 : index
    %24 = vector.load %arg3[%c3, %c0_38, %c0_39] : memref<9x128x128xbf16, #tpu.memory_space<vmem>>, vector<1x128x128xbf16>
    %25 = vector.shape_cast %24 : vector<1x128x128xbf16> to vector<128x128xbf16>
    %cst_40 = arith.constant dense<0.000000e+00> : vector<128x128xf32>
    %26 = tpu.matmul %23, %25, %cst_40 {dimension_numbers = #tpu.dot_dimension_numbers<[1], [0], [0], [1], [0, 0, 1, 1], [], []>} : vector<128x128xbf16>, vector<128x128xbf16>, vector<128x128xf32> -> vector<128x128xf32>
    %c0_41 = arith.constant 0 : index
    %c0_42 = arith.constant 0 : index
    %27 = vector.load %arg7[%c0_41, %c0_42] : memref<128x128xf32, #tpu.memory_space<vmem>>, vector<128x128xf32>
    %28 = arith.addf %27, %26 : vector<128x128xf32>
    %c0_43 = arith.constant 0 : index
    %c0_44 = arith.constant 0 : index
    %29 = vector.load %arg7[%c0_43, %c0_44] : memref<128x128xf32, #tpu.memory_space<vmem>>, vector<128x128xf32>
    tpu.vector_store %arg7[%c0_43, %c0_44], %28 {strides = array<i32>} : memref<128x128xf32, #tpu.memory_space<vmem>>, vector<128x128xf32>,
    %c0_45 = arith.constant 0 : index
    %c0_46 = arith.constant 0 : index
    %c3_47 = arith.constant 3 : index
    %c0_48 = arith.constant 0 : index
    %c0_49 = arith.constant 0 : index
    %30 = vector.load %arg2[%c0_45, %c0_46, %c3_47, %c0_48, %c0_49] : memref<1x1x4x160x128xbf16, #tpu.memory_space<vmem>>, vector<1x1x1x128x128xbf16>
    %31 = vector.shape_cast %30 : vector<1x1x1x128x128xbf16> to vector<128x128xbf16>
    %c4 = arith.constant 4 : index
    %c0_50 = arith.constant 0 : index
    %c0_51 = arith.constant 0 : index
    %32 = vector.load %arg3[%c4, %c0_50, %c0_51] : memref<9x128x128xbf16, #tpu.memory_space<vmem>>, vector<1x128x128xbf16>
    %33 = vector.shape_cast %32 : vector<1x128x128xbf16> to vector<128x128xbf16>
    %cst_52 = arith.constant dense<0.000000e+00> : vector<128x128xf32>
    %34 = tpu.matmul %31, %33, %cst_52 {dimension_numbers = #tpu.dot_dimension_numbers<[1], [0], [0], [1], [0, 0, 1, 1], [], []>} : vector<128x128xbf16>, vector<128x128xbf16>, vector<128x128xf32> -> vector<128x128xf32>
    %c0_53 = arith.constant 0 : index
    %c0_54 = arith.constant 0 : index
    %35 = vector.load %arg7[%c0_53, %c0_54] : memref<128x128xf32, #tpu.memory_space<vmem>>, vector<128x128xf32>
    %36 = arith.addf %35, %34 : vector<128x128xf32>
    %c0_55 = arith.constant 0 : index
    %c0_56 = arith.constant 0 : index
    %37 = vector.load %arg7[%c0_55, %c0_56] : memref<128x128xf32, #tpu.memory_space<vmem>>, vector<128x128xf32>
    tpu.vector_store %arg7[%c0_55, %c0_56], %36 {strides = array<i32>} : memref<128x128xf32, #tpu.memory_space<vmem>>, vector<128x128xf32>,
    %c0_57 = arith.constant 0 : index
    %c0_58 = arith.constant 0 : index
    %c2_59 = arith.constant 2 : index
    %c1_60 = arith.constant 1 : index
    %c0_61 = arith.constant 0 : index
    %38 = vector.load %arg2[%c0_57, %c0_58, %c2_59, %c1_60, %c0_61] : memref<1x1x4x160x128xbf16, #tpu.memory_space<vmem>>, vector<1x1x1x128x128xbf16>
    %39 = vector.shape_cast %38 : vector<1x1x1x128x128xbf16> to vector<128x128xbf16>
    %c5 = arith.constant 5 : index
    %c0_62 = arith.constant 0 : index
    %c0_63 = arith.constant 0 : index
    %40 = vector.load %arg3[%c5, %c0_62, %c0_63] : memref<9x128x128xbf16, #tpu.memory_space<vmem>>, vector<1x128x128xbf16>
    %41 = vector.shape_cast %40 : vector<1x128x128xbf16> to vector<128x128xbf16>
    %cst_64 = arith.constant dense<0.000000e+00> : vector<128x128xf32>
    %42 = tpu.matmul %39, %41, %cst_64 {dimension_numbers = #tpu.dot_dimension_numbers<[1], [0], [0], [1], [0, 0, 1, 1], [], []>} : vector<128x128xbf16>, vector<128x128xbf16>, vector<128x128xf32> -> vector<128x128xf32>
    %c0_65 = arith.constant 0 : index
    %c0_66 = arith.constant 0 : index
    %43 = vector.load %arg7[%c0_65, %c0_66] : memref<128x128xf32, #tpu.memory_space<vmem>>, vector<128x128xf32>
    %44 = arith.addf %43, %42 : vector<128x128xf32>
    %c0_67 = arith.constant 0 : index
    %c0_68 = arith.constant 0 : index
    %45 = vector.load %arg7[%c0_67, %c0_68] : memref<128x128xf32, #tpu.memory_space<vmem>>, vector<128x128xf32>
    tpu.vector_store %arg7[%c0_67, %c0_68], %44 {strides = array<i32>} : memref<128x128xf32, #tpu.memory_space<vmem>>, vector<128x128xf32>,
    %c0_69 = arith.constant 0 : index
    %c0_70 = arith.constant 0 : index
    %c0_71 = arith.constant 0 : index
    %c16 = arith.constant 16 : index
    %c0_72 = arith.constant 0 : index
    %46 = vector.load %arg2[%c0_69, %c0_70, %c0_71, %c16, %c0_72] : memref<1x1x4x160x128xbf16, #tpu.memory_space<vmem>>, vector<1x1x1x128x128xbf16>
    %47 = vector.shape_cast %46 : vector<1x1x1x128x128xbf16> to vector<128x128xbf16>
    %c6 = arith.constant 6 : index
    %c0_73 = arith.constant 0 : index
    %c0_74 = arith.constant 0 : index
    %48 = vector.load %arg3[%c6, %c0_73, %c0_74] : memref<9x128x128xbf16, #tpu.memory_space<vmem>>, vector<1x128x128xbf16>
    %49 = vector.shape_cast %48 : vector<1x128x128xbf16> to vector<128x128xbf16>
    %cst_75 = arith.constant dense<0.000000e+00> : vector<128x128xf32>
    %50 = tpu.matmul %47, %49, %cst_75 {dimension_numbers = #tpu.dot_dimension_numbers<[1], [0], [0], [1], [0, 0, 1, 1], [], []>} : vector<128x128xbf16>, vector<128x128xbf16>, vector<128x128xf32> -> vector<128x128xf32>
    %c0_76 = arith.constant 0 : index
    %c0_77 = arith.constant 0 : index
    %51 = vector.load %arg7[%c0_76, %c0_77] : memref<128x128xf32, #tpu.memory_space<vmem>>, vector<128x128xf32>
    %52 = arith.addf %51, %50 : vector<128x128xf32>
    %c0_78 = arith.constant 0 : index
    %c0_79 = arith.constant 0 : index
    %53 = vector.load %arg7[%c0_78, %c0_79] : memref<128x128xf32, #tpu.memory_space<vmem>>, vector<128x128xf32>
    tpu.vector_store %arg7[%c0_78, %c0_79], %52 {strides = array<i32>} : memref<128x128xf32, #tpu.memory_space<vmem>>, vector<128x128xf32>,
    %c0_80 = arith.constant 0 : index
    %c0_81 = arith.constant 0 : index
    %c1_82 = arith.constant 1 : index
    %c16_83 = arith.constant 16 : index
    %c0_84 = arith.constant 0 : index
    %54 = vector.load %arg2[%c0_80, %c0_81, %c1_82, %c16_83, %c0_84] : memref<1x1x4x160x128xbf16, #tpu.memory_space<vmem>>, vector<1x1x1x128x128xbf16>
    %55 = vector.shape_cast %54 : vector<1x1x1x128x128xbf16> to vector<128x128xbf16>
    %c7 = arith.constant 7 : index
    %c0_85 = arith.constant 0 : index
    %c0_86 = arith.constant 0 : index
    %56 = vector.load %arg3[%c7, %c0_85, %c0_86] : memref<9x128x128xbf16, #tpu.memory_space<vmem>>, vector<1x128x128xbf16>
    %57 = vector.shape_cast %56 : vector<1x128x128xbf16> to vector<128x128xbf16>
    %cst_87 = arith.constant dense<0.000000e+00> : vector<128x128xf32>
    %58 = tpu.matmul %55, %57, %cst_87 {dimension_numbers = #tpu.dot_dimension_numbers<[1], [0], [0], [1], [0, 0, 1, 1], [], []>} : vector<128x128xbf16>, vector<128x128xbf16>, vector<128x128xf32> -> vector<128x128xf32>
    %c0_88 = arith.constant 0 : index
    %c0_89 = arith.constant 0 : index
    %59 = vector.load %arg7[%c0_88, %c0_89] : memref<128x128xf32, #tpu.memory_space<vmem>>, vector<128x128xf32>
    %60 = arith.addf %59, %58 : vector<128x128xf32>
    %c0_90 = arith.constant 0 : index
    %c0_91 = arith.constant 0 : index
    %61 = vector.load %arg7[%c0_90, %c0_91] : memref<128x128xf32, #tpu.memory_space<vmem>>, vector<128x128xf32>
    tpu.vector_store %arg7[%c0_90, %c0_91], %60 {strides = array<i32>} : memref<128x128xf32, #tpu.memory_space<vmem>>, vector<128x128xf32>,
    %c0_92 = arith.constant 0 : index
    %c0_93 = arith.constant 0 : index
    %c0_94 = arith.constant 0 : index
    %c17 = arith.constant 17 : index
    %c0_95 = arith.constant 0 : index
    %62 = vector.load %arg2[%c0_92, %c0_93, %c0_94, %c17, %c0_95] : memref<1x1x4x160x128xbf16, #tpu.memory_space<vmem>>, vector<1x1x1x128x128xbf16>
    %63 = vector.shape_cast %62 : vector<1x1x1x128x128xbf16> to vector<128x128xbf16>
    %c8 = arith.constant 8 : index
    %c0_96 = arith.constant 0 : index
    %c0_97 = arith.constant 0 : index
    %64 = vector.load %arg3[%c8, %c0_96, %c0_97] : memref<9x128x128xbf16, #tpu.memory_space<vmem>>, vector<1x128x128xbf16>
    %65 = vector.shape_cast %64 : vector<1x128x128xbf16> to vector<128x128xbf16>
    %cst_98 = arith.constant dense<0.000000e+00> : vector<128x128xf32>
    %66 = tpu.matmul %63, %65, %cst_98 {dimension_numbers = #tpu.dot_dimension_numbers<[1], [0], [0], [1], [0, 0, 1, 1], [], []>} : vector<128x128xbf16>, vector<128x128xbf16>, vector<128x128xf32> -> vector<128x128xf32>
    %c0_99 = arith.constant 0 : index
    %c0_100 = arith.constant 0 : index
    %67 = vector.load %arg7[%c0_99, %c0_100] : memref<128x128xf32, #tpu.memory_space<vmem>>, vector<128x128xf32>
    %68 = arith.addf %67, %66 : vector<128x128xf32>
    %c0_101 = arith.constant 0 : index
    %c0_102 = arith.constant 0 : index
    %69 = vector.load %arg7[%c0_101, %c0_102] : memref<128x128xf32, #tpu.memory_space<vmem>>, vector<128x128xf32>
    tpu.vector_store %arg7[%c0_101, %c0_102], %68 {strides = array<i32>} : memref<128x128xf32, #tpu.memory_space<vmem>>, vector<128x128xf32>,
    %c0_103 = arith.constant 0 : index
    %c0_104 = arith.constant 0 : index
    %70 = vector.load %arg7[%c0_103, %c0_104] : memref<128x128xf32, #tpu.memory_space<vmem>>, vector<128x128xf32>
    %c0_105 = arith.constant 0 : index
    %c0_106 = arith.constant 0 : index
    %71 = vector.load %arg4[%c0_105, %c0_106] : memref<1x128xf32, #tpu.memory_space<vmem>>, vector<1x128xf32>
    %72 = vector.broadcast %71 : vector<1x128xf32> to vector<128x128xf32>
    %73 = arith.mulf %70, %72 : vector<128x128xf32>
    %c0_107 = arith.constant 0 : index
    %c0_108 = arith.constant 0 : index
    %74 = vector.load %arg5[%c0_107, %c0_108] : memref<1x128xf32, #tpu.memory_space<vmem>>, vector<1x128xf32>
    %75 = vector.broadcast %74 : vector<1x128xf32> to vector<128x128xf32>
    %76 = arith.addf %73, %75 : vector<128x128xf32>
    %cst_109 = arith.constant 0.000000e+00 : f32
    %77 = vector.broadcast %cst_109 : f32 to vector<128x128xf32>
    %78 = arith.maximumf %76, %77 : vector<128x128xf32>
    %79 = arith.truncf %78 : vector<128x128xf32> to vector<128x128xbf16>
    %c0_110 = arith.constant 0 : index
    %c0_111 = arith.constant 0 : index
    %c0_112 = arith.constant 0 : index
    %c0_113 = arith.constant 0 : index
    %80 = vector.load %arg6[%c0_110, %c0_111, %c0_112, %c0_113] : memref<1x1x128x128xbf16, #tpu.memory_space<vmem>>, vector<1x1x128x128xbf16>
    %81 = vector.shape_cast %80 : vector<1x1x128x128xbf16> to vector<128x128xbf16>
    %82 = vector.shape_cast %79 : vector<128x128xbf16> to vector<1x1x128x128xbf16>
    tpu.vector_store %arg6[%c0_110, %c0_111, %c0_112, %c0_113], %82 {strides = array<i32>} : memref<1x1x128x128xbf16, #tpu.memory_space<vmem>>, vector<1x1x128x128xbf16>,
    return
  }
  func.func @transform_0(%arg0: i32, %arg1: i32) -> (i32, i32, i32, i32, i32) {
    %c0_i32 = arith.constant 0 : i32
    %c0_i32_0 = arith.constant 0 : i32
    %c0_i32_1 = arith.constant 0 : i32
    %c0_i32_2 = arith.constant 0 : i32
    return %arg0, %arg1, %c0_i32, %c0_i32_0, %c0_i32_1 : i32, i32, i32, i32, i32
  }
  func.func @transform_1(%arg0: i32, %arg1: i32) -> (i32, i32, i32) {
    %c0_i32 = arith.constant 0 : i32
    %c0_i32_0 = arith.constant 0 : i32
    %c0_i32_1 = arith.constant 0 : i32
    %c0_i32_2 = arith.constant 0 : i32
    return %c0_i32, %c0_i32_0, %c0_i32_1 : i32, i32, i32
  }
  func.func @transform_2(%arg0: i32, %arg1: i32) -> (i32, i32) {
    %c0_i32 = arith.constant 0 : i32
    %c0_i32_0 = arith.constant 0 : i32
    %c0_i32_1 = arith.constant 0 : i32
    return %c0_i32, %c0_i32_0 : i32, i32
  }
  func.func @transform_3(%arg0: i32, %arg1: i32) -> (i32, i32) {
    %c0_i32 = arith.constant 0 : i32
    %c0_i32_0 = arith.constant 0 : i32
    %c0_i32_1 = arith.constant 0 : i32
    return %c0_i32, %c0_i32_0 : i32, i32
  }
  func.func @transform_4(%arg0: i32, %arg1: i32) -> (i32, i32, i32, i32) {
    %c0_i32 = arith.constant 0 : i32
    %c0_i32_0 = arith.constant 0 : i32
    %c0_i32_1 = arith.constant 0 : i32
    return %arg0, %arg1, %c0_i32, %c0_i32_0 : i32, i32, i32, i32
  }
}

</mosaic_0001>

<bundles_post_ra>
// kernel: bottleneck_forward.3
= control target key start
LH: loop header
LB: loop body
LE: loop exit
PB: predicated region body
PF: predicated region fallthrough
CT: control target
= control target key end

     0   :  { %s854_s15 = smov 0   ;;  %s946_s0 = inlined_call_operand.vmem [shape: bf16[512,128], index: 0, kind: input, shape index: {}]   ;;  %s947_s1 = inlined_call_operand.vmem [shape: bf16[128,128], index: 1, kind: input, shape index: {}]   ;;  %s948_s2 = inlined_call_operand.vmem [shape: f32[1,128], index: 2, kind: input, shape index: {}]   ;;  %s949_s3 = inlined_call_operand.vmem [shape: f32[1,128], index: 3, kind: input, shape index: {}]   ;;  %s950_s4 = inlined_call_operand.vmem [shape: bf16[512,128], index: 4, kind: output, shape index: {}]  }
   0x1 LB: > { %s625_s16 = sadd.s32 4294967295, %s827_s15   ;;  %p629_p0 = scmp.ge.s32.totalorder %s827_s15, 1  ;;  %s827_s15 = sphi %s854_s15, %s14_s15  }
   0x2   : > { %p163_p1 = scmp.lt.s32.totalorder %s827_s15, 5 }
   0x4   : > { %p164_p2 = pnand %p629_p0, %p163_p1 }
   0x5   : > { %v805_v0 = vld [vmem:[%s947_s1] sm:$0xff] (!%p164_p2)   ;;  %s630_s19 = sshll.u32 (!%p164_p2), %s625_s16, 4  ;;  %v806_v1 = vld [vmem:[%s947_s1 + $0x8] sm:$0xff] (!%p164_p2)   ;;  %v807_v2 = vld [vmem:[%s947_s1 + $0x10] sm:$0xff] (!%p164_p2)  }
   0x6   : > { %167 = sbr.rel (%p164_p2) target bundleno = 271 (0x10f), region = 36  ;;  %p190_p3 = scmp.lt.s32.totalorder (!%p164_p2), %s630_s19, 63  ;;  %749 = vmatprep.subr.bf16.mxu0 (!%p164_p2), %v805_v0  ;;  %781 = vmatprep.subr.bf16.mxu1 (!%p164_p2), %v805_v0  ;;  %v808_v3 = vld [vmem:[%s947_s1 + $0x18] sm:$0xff] (!%p164_p2)   ;;  %v809_v6 = vld [vmem:[%s947_s1 + $0x20] sm:$0xff] (!%p164_p2)   ;;  %v810_v7 = vld [vmem:[%s947_s1 + $0x28] sm:$0xff] (!%p164_p2)  }
   0x7   : > { %750 = vmatpush3.bf16.msra.mxu0 (!%p164_p2), %v805_v0  ;;  %789 = vmatpush3.bf16.msra.mxu1 (!%p164_p2), %v805_v0  ;;  %v811_v8 = vld [vmem:[%s947_s1 + $0x30] sm:$0xff] (!%p164_p2)   ;;  %v812_v9 = vld [vmem:[%s947_s1 + $0x38] sm:$0xff] (!%p164_p2)   ;;  %v650_v16 = vld [vmem:[%s948_s2] ss:$0 sm:$0xff] (!%p164_p2) }
   0x8   : > { %751 = vmatprep.subr.bf16.mxu0 (!%p164_p2), %v806_v1  ;;  %782 = vmatprep.subr.bf16.mxu1 (!%p164_p2), %v806_v1  ;;  %v910_v18 = vld [vmem:[%s949_s3] ss:$0 sm:$0xff] (!%p164_p2) }
   0xb   : > { %752 = vmatpush3.bf16.msra.mxu0 (!%p164_p2), %v806_v1  ;;  %790 = vmatpush3.bf16.msra.mxu1 (!%p164_p2), %v806_v1 }
   0xc   : > { %753 = vmatprep.subr.bf16.mxu0 (!%p164_p2), %v807_v2  ;;  %783 = vmatprep.subr.bf16.mxu1 (!%p164_p2), %v807_v2 }
   0xd   : > { %s952_s19 = smov (!%p190_p3, %s630_s19), 63 }
   0xe   : > { %s631_s24 = sshll.u32 %s952_s19, 2 }
   0xf   : > { %s879_s27 = scalar_lea.vmem %s946_s0, %s631_s24  ;;  %754 = vmatpush3.bf16.msra.mxu0 %v807_v2  ;;  %791 = vmatpush3.bf16.msra.mxu1 %v807_v2  ;;  %s925_s20 = scalar_lea.vmem %s950_s4, %s631_s24 }
  0x10   : > { %v813_v4 = vld [vmem:[%s879_s27] sm:$0xff]   ;;  %755 = vmatprep.subr.bf16.mxu0 %v808_v3  ;;  %784 = vmatprep.subr.bf16.mxu1 %v808_v3  ;;  %v815_v10 = vld [vmem:[%s879_s27 + $0x8] sm:$0xff]   ;;  %v817_v12 = vld [vmem:[%s879_s27 + $0x10] sm:$0xff]  }
  0x11   : > { %v814_v5 = vld [vmem:[%s879_s27 + $0x20] sm:$0xff]   ;;  %765 = vmatprep.mubr.bf16.mxu0 %v813_v4  ;;  %v816_v11 = vld [vmem:[%s879_s27 + $0x28] sm:$0xff]   ;;  %v818_v13 = vld [vmem:[%s879_s27 + $0x30] sm:$0xff]  }
  0x12   : > { %773 = vmatprep.mubr.bf16.mxu1 %v814_v5  ;;  %v819_v14 = vld [vmem:[%s879_s27 + $0x18] sm:$0xff]  }
  0x13   : > { %756 = vmatpush3.bf16.msra.mxu0 %v808_v3  ;;  %792 = vmatpush3.bf16.msra.mxu1 %v808_v3  ;;  %v820_v15 = vld [vmem:[%s879_s27 + $0x38] sm:$0xff]  }
  0x14   : > { %757 = vmatprep.subr.bf16.mxu0 %v809_v6  ;;  %785 = vmatprep.subr.bf16.mxu1 %v809_v6 }
  0x17   : > { %758 = vmatpush3.bf16.msra.mxu0 %v809_v6  ;;  %793 = vmatpush3.bf16.msra.mxu1 %v809_v6 }
  0x18   : > { %759 = vmatprep.subr.bf16.mxu0 %v810_v7  ;;  %786 = vmatprep.subr.bf16.mxu1 %v810_v7 }
  0x1b   : > { %760 = vmatpush3.bf16.msra.mxu0 %v810_v7  ;;  %794 = vmatpush3.bf16.msra.mxu1 %v810_v7 }
  0x1c   : > { %761 = vmatprep.subr.bf16.mxu0 %v811_v8  ;;  %787 = vmatprep.subr.bf16.mxu1 %v811_v8 }
  0x1f   : > { %762 = vmatpush3.bf16.msra.mxu0 %v811_v8  ;;  %795 = vmatpush3.bf16.msra.mxu1 %v811_v8 }
  0x20   : > { %763 = vmatprep.subr.bf16.mxu0 %v812_v9  ;;  %788 = vmatprep.subr.bf16.mxu1 %v812_v9 }
  0x23   : > { %764 = vmatpush3.bf16.msra.mxu0 %v812_v9  ;;  %796 = vmatpush3.bf16.msra.mxu1 %v812_v9 }
  0x26   : > { %766 = vmatmul.mubr.bf16.vlgmr.msra.gmra.mrb[0].mxu0 %v815_v10  ;;  %774 = vmatmul.mubr.bf16.vlgmr.msra.gmra.mrb[0].mxu1 %v816_v11 }
  0x27   : > { %769 = vmatprep.mubr.bf16.mxu0 %v817_v12  ;;  %777 = vmatprep.mubr.bf16.mxu1 %v818_v13 }
  0x2e   : > { %770 = vmatmul.mubr.bf16.gmra.mrb[4].mxu0 %v819_v14  ;;  %778 = vmatmul.mubr.bf16.gmra.mrb[4].mxu1 %v820_v15 }
  0xf9   : > { %v767_v17 = vpop.f32.mrb[0].mxu0  ;;  %v775_v19 = vpop.f32.mrb[0].mxu1 }
  0xfa   : > { %v436_v20 = vmul.f32 %v767_v17, %v650_v16  ;;  %v444_v21 = vmul.f32 %v775_v19, %v650_v16  ;;  %v364_v22 = vpop.f32.mrb[1].mxu0  ;;  %v396_v23 = vpop.f32.mrb[1].mxu1 }
  0xfb   : > { %v434_v24 = vmul.f32 %v650_v16, %v364_v22  ;;  %v442_v25 = vmul.f32 %v650_v16, %v396_v23  ;;  %v768_v26 = vpop.f32.mrb[2].mxu0  ;;  %v776_v27 = vpop.f32.mrb[2].mxu1 }
  0xfc   : > { %v459_v28 = vadd.f32 %v910_v18, %v436_v20  ;;  %v467_v29 = vadd.f32 %v910_v18, %v444_v21  ;;  %v437_v30 = vmul.f32 %v768_v26, %v650_v16  ;;  %v445_v31 = vmul.f32 %v776_v27, %v650_v16  ;;  %v367_v32 = vpop.f32.mrb[3].mxu0  ;;  %v399_v33 = vpop.f32.mrb[3].mxu1 }
  0xfd   : > { %v457_v34 = vadd.f32 %v910_v18, %v434_v24  ;;  %v465_v35 = vadd.f32 %v910_v18, %v442_v25  ;;  %v435_v36 = vmul.f32 %v650_v16, %v367_v32  ;;  %v443_v37 = vmul.f32 %v650_v16, %v399_v33 }
  0xfe   : > { %v460_v38 = vadd.f32 %v910_v18, %v437_v30  ;;  %v468_v39 = vadd.f32 %v910_v18, %v445_v31  ;;  %v475_v42 = vmax.f32 %v459_v28, 0.0  ;;  %v483_v43 = vmax.f32 %v467_v29, 0.0 }
  0xff   : > { %v458_v40 = vadd.f32 %v910_v18, %v435_v36  ;;  %v466_v41 = vadd.f32 %v910_v18, %v443_v37  ;;  %v473_v46 = vmax.f32 %v457_v34, 0.0  ;;  %v481_v47 = vmax.f32 %v465_v35, 0.0 }
 0x100   : > { %v476_v44 = vmax.f32 %v460_v38, 0.0  ;;  %v484_v45 = vmax.f32 %v468_v39, 0.0 }
 0x101   : > { %v474_v48 = vmax.f32 %v458_v40, 0.0  ;;  %v482_v49 = vmax.f32 %v466_v41, 0.0  ;;  %v771_v50 = vpop.f32.mrb[4].mxu0  ;;  %v779_v51 = vpop.f32.mrb[4].mxu1 }
 0x102   : > { %v694_v52 = vpack.c.bf16 %v476_v44, %v475_v42  ;;  %v714_v53 = vpack.c.bf16 %v484_v45, %v483_v43  ;;  %v440_v54 = vmul.f32 %v771_v50, %v650_v16  ;;  %v448_v55 = vmul.f32 %v779_v51, %v650_v16  ;;  %v380_v56 = vpop.f32.mrb[5].mxu0  ;;  %v412_v57 = vpop.f32.mrb[5].mxu1 }
 0x103   : > { %v689_v58 = vpack.c.bf16 %v474_v48, %v473_v46  ;;  %v709_v59 = vpack.c.bf16 %v482_v49, %v481_v47  ;;  %v438_v60 = vmul.f32 %v650_v16, %v380_v56  ;;  %v446_v61 = vmul.f32 %v650_v16, %v412_v57  ;;  %v772_v62 = vpop.f32.mrb[6].mxu0  ;;  %v780_v63 = vpop.f32.mrb[6].mxu1 }
 0x104   : > { %726 = vst [vmem:[%s925_s20 + $0x8] sm:$0xff] %v694_v52   ;;  %730 = vst [vmem:[%s925_s20 + $0x28] sm:$0xff] %v714_v53   ;;  %v463_v0 = vadd.f32 %v910_v18, %v440_v54  ;;  %v471_v1 = vadd.f32 %v910_v18, %v448_v55  ;;  %v441_v2 = vmul.f32 %v772_v62, %v650_v16  ;;  %v383_v4 = vpop.f32.mrb[7].mxu0  ;;  %v415_v5 = vpop.f32.mrb[7].mxu1 }
 0x105   : > { %v449_v3 = vmul.f32 %v780_v63, %v650_v16  ;;  %690 = vst [vmem:[%s925_s20] sm:$0xff] %v689_v58   ;;  %729 = vst [vmem:[%s925_s20 + $0x20] sm:$0xff] %v709_v59   ;;  %v461_v6 = vadd.f32 %v910_v18, %v438_v60  ;;  %v469_v7 = vadd.f32 %v910_v18, %v446_v61 }
 0x106   : > { %v439_v8 = vmul.f32 %v650_v16, %v383_v4  ;;  %v447_v9 = vmul.f32 %v650_v16, %v415_v5  ;;  %v464_v10 = vadd.f32 %v910_v18, %v441_v2  ;;  %v479_v14 = vmax.f32 %v463_v0, 0.0 }
 0x107   : > { %v472_v11 = vadd.f32 %v910_v18, %v449_v3  ;;  %v487_v15 = vmax.f32 %v471_v1, 0.0  ;;  %v477_v20 = vmax.f32 %v461_v6, 0.0  ;;  %v485_v21 = vmax.f32 %v469_v7, 0.0 }
 0x108   : > { %v462_v12 = vadd.f32 %v910_v18, %v439_v8  ;;  %v470_v13 = vadd.f32 %v910_v18, %v447_v9  ;;  %v480_v17 = vmax.f32 %v464_v10, 0.0 }
 0x109   : > { %v488_v19 = vmax.f32 %v472_v11, 0.0 }
 0x10a   : > { %v478_v22 = vmax.f32 %v462_v12, 0.0  ;;  %v486_v16 = vmax.f32 %v470_v13, 0.0  ;;  %v704_v23 = vpack.c.bf16 %v480_v17, %v479_v14 }
 0x10b   : > { %v724_v24 = vpack.c.bf16 %v488_v19, %v487_v15 }
 0x10c   : > { %v699_v25 = vpack.c.bf16 %v478_v22, %v477_v20  ;;  %v719_v26 = vpack.c.bf16 %v486_v16, %v485_v21  ;;  %728 = vst [vmem:[%s925_s20 + $0x18] sm:$0xff] %v704_v23  }
 0x10d   : > { %732 = vst [vmem:[%s925_s20 + $0x38] sm:$0xff] %v724_v24  }
 0x10e   : > { %727 = vst [vmem:[%s925_s20 + $0x10] sm:$0xff] %v699_v25   ;;  %731 = vst [vmem:[%s925_s20 + $0x30] sm:$0xff] %v719_v26  }
 0x10f PF: > { %s14_s15 = sadd.s32 1, %s827_s15  }
 0x110   : > { %p11_p4 = scmp.ge.s32.totalorder %s14_s15, 6  }
 0x112   :  { %13 = sbr.rel (!%p11_p4) target bundleno = 1 (0x1), region = 66 }

// kernel: bottleneck_forward.5
= control target key start
LH: loop header
LB: loop body
LE: loop exit
PB: predicated region body
PF: predicated region fallthrough
CT: control target
= control target key end

     0   :  { %s1180_s1 = inlined_call_operand.vmem [shape: bf16[128,128], index: 1, kind: input, shape index: {}]   ;;  %s1181_s5 = inlined_call_operand.vmem [shape: bf16[128,128], index: 5, kind: input, shape index: {}]   ;;  %s1182_s0 = inlined_call_operand.vmem [shape: bf16[128,128], index: 0, kind: input, shape index: {}]   ;;  %s1183_s4 = inlined_call_operand.vmem [shape: bf16[128,128], index: 4, kind: input, shape index: {}]   ;;  %s1184_s2 = inlined_call_operand.vmem [shape: f32[1,128], index: 2, kind: input, shape index: {}]   ;;  %s1185_s6 = inlined_call_operand.vmem [shape: f32[1,128], index: 6, kind: input, shape index: {}]   ;;  %s1186_s3 = inlined_call_operand.vmem [shape: f32[1,128], index: 3, kind: input, shape index: {}]   ;;  %s1187_s7 = inlined_call_operand.vmem [shape: f32[1,128], index: 7, kind: input, shape index: {}]   ;;  %s1188_s8 = inlined_call_operand.vmem [shape: bf16[128,128], index: 8, kind: output, shape index: {}]  }
   0x1   :  { %v899_v0 = vld [vmem:[%s1180_s1] sm:$0xff]   ;;  %v901_v2 = vld [vmem:[%s1180_s1 + $0x8] sm:$0xff]   ;;  %v903_v4 = vld [vmem:[%s1180_s1 + $0x10] sm:$0xff]  }
   0x2   :  { %v900_v1 = vld [vmem:[%s1181_s5] sm:$0xff]   ;;  %835 = vmatprep.subr.bf16.mxu0 %v899_v0  ;;  %v902_v3 = vld [vmem:[%s1181_s5 + $0x8] sm:$0xff]   ;;  %v904_v5 = vld [vmem:[%s1181_s5 + $0x10] sm:$0xff]  }
   0x3   :  { %867 = vmatprep.subr.bf16.mxu1 %v900_v1  ;;  %836 = vmatpush3.bf16.msra.mxu0 %v899_v0  ;;  %v905_v6 = vld [vmem:[%s1180_s1 + $0x18] sm:$0xff]   ;;  %v907_v8 = vld [vmem:[%s1180_s1 + $0x20] sm:$0xff]   ;;  %v909_v10 = vld [vmem:[%s1180_s1 + $0x28] sm:$0xff]  }
   0x4   :  { %868 = vmatpush3.bf16.msra.mxu1 %v900_v1  ;;  %837 = vmatprep.subr.bf16.mxu0 %v901_v2  ;;  %v906_v7 = vld [vmem:[%s1181_s5 + $0x18] sm:$0xff]   ;;  %v908_v9 = vld [vmem:[%s1181_s5 + $0x20] sm:$0xff]   ;;  %v910_v11 = vld [vmem:[%s1181_s5 + $0x28] sm:$0xff]  }
   0x5   :  { %869 = vmatprep.subr.bf16.mxu1 %v902_v3  ;;  %v915_v12 = vld [vmem:[%s1182_s0] sm:$0xff]   ;;  %v911_v14 = vld [vmem:[%s1180_s1 + $0x30] sm:$0xff]   ;;  %v913_v16 = vld [vmem:[%s1180_s1 + $0x38] sm:$0xff]  }
   0x6   :  { %v916_v13 = vld [vmem:[%s1183_s4] sm:$0xff]   ;;  %851 = vmatprep.mubr.bf16.mxu0 %v915_v12  ;;  %v912_v15 = vld [vmem:[%s1181_s5 + $0x30] sm:$0xff]   ;;  %v914_v17 = vld [vmem:[%s1181_s5 + $0x38] sm:$0xff]  }
   0x7   :  { %838 = vmatpush3.bf16.msra.mxu0 %v901_v2  ;;  %883 = vmatprep.mubr.bf16.mxu1 %v916_v13  ;;  %v917_v18 = vld [vmem:[%s1182_s0 + $0x8] sm:$0xff]   ;;  %v919_v20 = vld [vmem:[%s1182_s0 + $0x10] sm:$0xff]   ;;  %v921_v22 = vld [vmem:[%s1182_s0 + $0x18] sm:$0xff]  }
   0x8   :  { %870 = vmatpush3.bf16.msra.mxu1 %v902_v3  ;;  %839 = vmatprep.subr.bf16.mxu0 %v903_v4  ;;  %v918_v19 = vld [vmem:[%s1183_s4 + $0x8] sm:$0xff]   ;;  %v920_v21 = vld [vmem:[%s1183_s4 + $0x10] sm:$0xff]   ;;  %v922_v23 = vld [vmem:[%s1183_s4 + $0x18] sm:$0xff]  }
   0x9   :  { %871 = vmatprep.subr.bf16.mxu1 %v904_v5  ;;  %v923_v24 = vld [vmem:[%s1182_s0 + $0x20] sm:$0xff]   ;;  %v925_v26 = vld [vmem:[%s1182_s0 + $0x28] sm:$0xff]   ;;  %v927_v28 = vld [vmem:[%s1182_s0 + $0x30] sm:$0xff]  }
   0xa   :  { %v924_v25 = vld [vmem:[%s1183_s4 + $0x20] sm:$0xff]   ;;  %v926_v27 = vld [vmem:[%s1183_s4 + $0x28] sm:$0xff]   ;;  %v928_v29 = vld [vmem:[%s1183_s4 + $0x30] sm:$0xff]  }
   0xb   :  { %840 = vmatpush3.bf16.msra.mxu0 %v903_v4  ;;  %v929_v30 = vld [vmem:[%s1182_s0 + $0x38] sm:$0xff]   ;;  %v1075_v32 = vld [vmem:[%s1184_s2] ss:$0 sm:$0xff] }
   0xc   :  { %872 = vmatpush3.bf16.msra.mxu1 %v904_v5  ;;  %841 = vmatprep.subr.bf16.mxu0 %v905_v6  ;;  %v930_v31 = vld [vmem:[%s1183_s4 + $0x38] sm:$0xff]   ;;  %v1080_v33 = vld [vmem:[%s1185_s6] ss:$0 sm:$0xff] }
   0xd   :  { %873 = vmatprep.subr.bf16.mxu1 %v906_v7  ;;  %v1085_v35 = vld [vmem:[%s1186_s3] ss:$0 sm:$0xff] }
   0xe   :  { %v1091_v38 = vld [vmem:[%s1187_s7] ss:$0 sm:$0xff] }
   0xf   :  { %842 = vmatpush3.bf16.msra.mxu0 %v905_v6 }
  0x10   :  { %874 = vmatpush3.bf16.msra.mxu1 %v906_v7  ;;  %843 = vmatprep.subr.bf16.mxu0 %v907_v8 }
  0x11   :  { %875 = vmatprep.subr.bf16.mxu1 %v908_v9 }
  0x13   :  { %844 = vmatpush3.bf16.msra.mxu0 %v907_v8 }
  0x14   :  { %876 = vmatpush3.bf16.msra.mxu1 %v908_v9  ;;  %845 = vmatprep.subr.bf16.mxu0 %v909_v10 }
  0x15   :  { %877 = vmatprep.subr.bf16.mxu1 %v910_v11 }
  0x17   :  { %846 = vmatpush3.bf16.msra.mxu0 %v909_v10 }
  0x18   :  { %878 = vmatpush3.bf16.msra.mxu1 %v910_v11  ;;  %847 = vmatprep.subr.bf16.mxu0 %v911_v14 }
  0x19   :  { %879 = vmatprep.subr.bf16.mxu1 %v912_v15 }
  0x1b   :  { %848 = vmatpush3.bf16.msra.mxu0 %v911_v14 }
  0x1c   :  { %880 = vmatpush3.bf16.msra.mxu1 %v912_v15  ;;  %849 = vmatprep.subr.bf16.mxu0 %v913_v16 }
  0x1d   :  { %881 = vmatprep.subr.bf16.mxu1 %v914_v17 }
  0x1f   :  { %850 = vmatpush3.bf16.msra.mxu0 %v913_v16 }
  0x20   :  { %882 = vmatpush3.bf16.msra.mxu1 %v914_v17 }
  0x22   :  { %852 = vmatmul.mubr.bf16.vlgmr.msra.gmra.mrb[0].mxu0 %v917_v18 }
  0x23   :  { %884 = vmatmul.mubr.bf16.vlgmr.msra.gmra.mrb[0].mxu1 %v918_v19  ;;  %855 = vmatprep.mubr.bf16.mxu0 %v919_v20 }
  0x24   :  { %887 = vmatprep.mubr.bf16.mxu1 %v920_v21 }
  0x2a   :  { %856 = vmatmul.mubr.bf16.gmra.mrb[4].mxu0 %v921_v22 }
  0x2b   :  { %888 = vmatmul.mubr.bf16.gmra.mrb[4].mxu1 %v922_v23  ;;  %859 = vmatprep.mubr.bf16.mxu0 %v923_v24 }
  0x2c   :  { %891 = vmatprep.mubr.bf16.mxu1 %v924_v25 }
  0x32   :  { %860 = vmatmul.mubr.bf16.gmra.mrb[8].mxu0 %v925_v26 }
  0x33   :  { %892 = vmatmul.mubr.bf16.gmra.mrb[8].mxu1 %v926_v27  ;;  %863 = vmatprep.mubr.bf16.mxu0 %v927_v28 }
  0x34   :  { %895 = vmatprep.mubr.bf16.mxu1 %v928_v29 }
  0x3a   :  { %864 = vmatmul.mubr.bf16.gmra.mrb[12].mxu0 %v929_v30 }
  0x3b   :  { %896 = vmatmul.mubr.bf16.gmra.mrb[12].mxu1 %v930_v31 }
  0xf5   :  { %v853_v34 = vpop.f32.mrb[0].mxu0 }
  0xf6   :  { %v264_v36 = vmul.f32 %v853_v34, %v1075_v32  ;;  %v885_v37 = vpop.f32.mrb[0].mxu1  ;;  %v192_v39 = vpop.f32.mrb[1].mxu0 }
  0xf7   :  { %v535_v40 = vmul.f32 %v885_v37, %v1080_v33  ;;  %v262_v41 = vmul.f32 %v1075_v32, %v192_v39  ;;  %v463_v42 = vpop.f32.mrb[1].mxu1  ;;  %v854_v43 = vpop.f32.mrb[2].mxu0 }
  0xf8   :  { %v287_v44 = vadd.f32 %v1085_v35, %v264_v36  ;;  %v533_v45 = vmul.f32 %v1080_v33, %v463_v42  ;;  %v265_v46 = vmul.f32 %v854_v43, %v1075_v32  ;;  %v886_v47 = vpop.f32.mrb[2].mxu1  ;;  %v195_v48 = vpop.f32.mrb[3].mxu0 }
  0xf9   :  { %v558_v49 = vadd.f32 %v1091_v38, %v535_v40  ;;  %v285_v50 = vadd.f32 %v1085_v35, %v262_v41  ;;  %v536_v51 = vmul.f32 %v886_v47, %v1080_v33  ;;  %v263_v52 = vmul.f32 %v1075_v32, %v195_v48  ;;  %v466_v53 = vpop.f32.mrb[3].mxu1 }
  0xfa   :  { %v556_v54 = vadd.f32 %v1091_v38, %v533_v45  ;;  %v288_v55 = vadd.f32 %v1085_v35, %v265_v46  ;;  %v534_v56 = vmul.f32 %v1080_v33, %v466_v53 }
  0xfb   :  { %v574_v57 = vadd.f32 %v558_v49, %v287_v44  ;;  %v559_v58 = vadd.f32 %v1091_v38, %v536_v51  ;;  %v286_v59 = vadd.f32 %v1085_v35, %v263_v52 }
  0xfc   :  { %v572_v60 = vadd.f32 %v556_v54, %v285_v50  ;;  %v557_v61 = vadd.f32 %v1091_v38, %v534_v56 }
  0xfd   :  { %v575_v62 = vadd.f32 %v559_v58, %v288_v55  ;;  %v857_v63 = vpop.f32.mrb[4].mxu0  ;;  %v590_v0 = vmax.f32 %v574_v57, 0.0 }
  0xfe   :  { %v573_v1 = vadd.f32 %v557_v61, %v286_v59  ;;  %v268_v2 = vmul.f32 %v857_v63, %v1075_v32  ;;  %v889_v3 = vpop.f32.mrb[4].mxu1  ;;  %v208_v4 = vpop.f32.mrb[5].mxu0  ;;  %v588_v5 = vmax.f32 %v572_v60, 0.0 }
  0xff   :  { %v591_v6 = vmax.f32 %v575_v62, 0.0  ;;  %v539_v7 = vmul.f32 %v889_v3, %v1080_v33  ;;  %v266_v8 = vmul.f32 %v1075_v32, %v208_v4  ;;  %v479_v9 = vpop.f32.mrb[5].mxu1  ;;  %v858_v10 = vpop.f32.mrb[6].mxu0 }
 0x100   :  { %v589_v11 = vmax.f32 %v573_v1, 0.0  ;;  %v291_v12 = vadd.f32 %v1085_v35, %v268_v2  ;;  %v537_v13 = vmul.f32 %v1080_v33, %v479_v9  ;;  %v269_v14 = vmul.f32 %v858_v10, %v1075_v32  ;;  %v890_v15 = vpop.f32.mrb[6].mxu1  ;;  %v211_v16 = vpop.f32.mrb[7].mxu0 }
 0x101   :  { %v764_v17 = vpack.c.bf16 %v591_v6, %v590_v0  ;;  %v562_v18 = vadd.f32 %v1091_v38, %v539_v7  ;;  %v289_v19 = vadd.f32 %v1085_v35, %v266_v8  ;;  %v540_v20 = vmul.f32 %v890_v15, %v1080_v33  ;;  %v482_v21 = vpop.f32.mrb[7].mxu1 }
 0x102   :  { %v759_v22 = vpack.c.bf16 %v589_v11, %v588_v5  ;;  %v560_v23 = vadd.f32 %v1091_v38, %v537_v13  ;;  %v292_v24 = vadd.f32 %v1085_v35, %v269_v14  ;;  %v267_v25 = vmul.f32 %v1075_v32, %v211_v16 }
 0x103   :  { %796 = vst [vmem:[%s1188_s8 + $0x8] sm:$0xff] %v764_v17   ;;  %v578_v26 = vadd.f32 %v562_v18, %v291_v12  ;;  %v563_v27 = vadd.f32 %v1091_v38, %v540_v20  ;;  %v538_v28 = vmul.f32 %v1080_v33, %v482_v21 }
 0x104   :  { %760 = vst [vmem:[%s1188_s8] sm:$0xff] %v759_v22   ;;  %v576_v29 = vadd.f32 %v560_v23, %v289_v19  ;;  %v290_v30 = vadd.f32 %v1085_v35, %v267_v25 }
 0x105   :  { %v579_v31 = vadd.f32 %v563_v27, %v292_v24  ;;  %v561_v34 = vadd.f32 %v1091_v38, %v538_v28  ;;  %v861_v36 = vpop.f32.mrb[8].mxu0  ;;  %v594_v37 = vmax.f32 %v578_v26, 0.0 }
 0x106   :  { %v272_v39 = vmul.f32 %v861_v36, %v1075_v32  ;;  %v893_v40 = vpop.f32.mrb[8].mxu1  ;;  %v224_v41 = vpop.f32.mrb[9].mxu0  ;;  %v592_v48 = vmax.f32 %v576_v29, 0.0 }
 0x107   :  { %v595_v42 = vmax.f32 %v579_v31, 0.0  ;;  %v577_v43 = vadd.f32 %v561_v34, %v290_v30  ;;  %v543_v44 = vmul.f32 %v893_v40, %v1080_v33  ;;  %v270_v45 = vmul.f32 %v1075_v32, %v224_v41  ;;  %v495_v46 = vpop.f32.mrb[9].mxu1  ;;  %v862_v47 = vpop.f32.mrb[10].mxu0 }
 0x108   :  { %v295_v49 = vadd.f32 %v1085_v35, %v272_v39  ;;  %v541_v50 = vmul.f32 %v1080_v33, %v495_v46  ;;  %v273_v51 = vmul.f32 %v862_v47, %v1075_v32  ;;  %v894_v52 = vpop.f32.mrb[10].mxu1  ;;  %v227_v53 = vpop.f32.mrb[11].mxu0 }
 0x109   :  { %v774_v54 = vpack.c.bf16 %v595_v42, %v594_v37  ;;  %v593_v55 = vmax.f32 %v577_v43, 0.0  ;;  %v566_v56 = vadd.f32 %v1091_v38, %v543_v44  ;;  %v293_v57 = vadd.f32 %v1085_v35, %v270_v45  ;;  %v498_v58 = vpop.f32.mrb[11].mxu1 }
 0x10a   :  { %v564_v59 = vadd.f32 %v1091_v38, %v541_v50  ;;  %v296_v60 = vadd.f32 %v1085_v35, %v273_v51  ;;  %v544_v61 = vmul.f32 %v894_v52, %v1080_v33  ;;  %v271_v62 = vmul.f32 %v1075_v32, %v227_v53 }
 0x10b   :  { %798 = vst [vmem:[%s1188_s8 + $0x18] sm:$0xff] %v774_v54   ;;  %v769_v63 = vpack.c.bf16 %v593_v55, %v592_v48  ;;  %v582_v0 = vadd.f32 %v566_v56, %v295_v49  ;;  %v542_v1 = vmul.f32 %v1080_v33, %v498_v58 }
 0x10c   :  { %v580_v2 = vadd.f32 %v564_v59, %v293_v57  ;;  %v567_v3 = vadd.f32 %v1091_v38, %v544_v61  ;;  %v294_v4 = vadd.f32 %v1085_v35, %v271_v62 }
 0x10d   :  { %797 = vst [vmem:[%s1188_s8 + $0x10] sm:$0xff] %v769_v63   ;;  %v565_v5 = vadd.f32 %v1091_v38, %v542_v1  ;;  %v865_v6 = vpop.f32.mrb[12].mxu0  ;;  %v598_v7 = vmax.f32 %v582_v0, 0.0 }
 0x10e   :  { %v583_v8 = vadd.f32 %v567_v3, %v296_v60  ;;  %v276_v9 = vmul.f32 %v865_v6, %v1075_v32  ;;  %v897_v10 = vpop.f32.mrb[12].mxu1  ;;  %v240_v11 = vpop.f32.mrb[13].mxu0  ;;  %v596_v12 = vmax.f32 %v580_v2, 0.0 }
 0x10f   :  { %v581_v13 = vadd.f32 %v565_v5, %v294_v4  ;;  %v547_v14 = vmul.f32 %v897_v10, %v1080_v33  ;;  %v274_v15 = vmul.f32 %v1075_v32, %v240_v11  ;;  %v511_v16 = vpop.f32.mrb[13].mxu1  ;;  %v866_v17 = vpop.f32.mrb[14].mxu0 }
 0x110   :  { %v599_v18 = vmax.f32 %v583_v8, 0.0  ;;  %v299_v19 = vadd.f32 %v1085_v35, %v276_v9  ;;  %v545_v20 = vmul.f32 %v1080_v33, %v511_v16  ;;  %v277_v21 = vmul.f32 %v866_v17, %v1075_v32  ;;  %v898_v22 = vpop.f32.mrb[14].mxu1  ;;  %v243_v23 = vpop.f32.mrb[15].mxu0 }
 0x111   :  { %v597_v24 = vmax.f32 %v581_v13, 0.0  ;;  %v570_v25 = vadd.f32 %v1091_v38, %v547_v14  ;;  %v297_v26 = vadd.f32 %v1085_v35, %v274_v15  ;;  %v548_v27 = vmul.f32 %v898_v22, %v1080_v33  ;;  %v514_v28 = vpop.f32.mrb[15].mxu1 }
 0x112   :  { %v784_v29 = vpack.c.bf16 %v599_v18, %v598_v7  ;;  %v568_v30 = vadd.f32 %v1091_v38, %v545_v20  ;;  %v300_v31 = vadd.f32 %v1085_v35, %v277_v21  ;;  %v275_v34 = vmul.f32 %v1075_v32, %v243_v23 }
 0x113   :  { %v779_v36 = vpack.c.bf16 %v597_v24, %v596_v12  ;;  %v586_v37 = vadd.f32 %v570_v25, %v299_v19  ;;  %v571_v39 = vadd.f32 %v1091_v38, %v548_v27  ;;  %v546_v40 = vmul.f32 %v1080_v33, %v514_v28 }
 0x114   :  { %800 = vst [vmem:[%s1188_s8 + $0x28] sm:$0xff] %v784_v29   ;;  %v584_v41 = vadd.f32 %v568_v30, %v297_v26  ;;  %v298_v42 = vadd.f32 %v1085_v35, %v275_v34 }
 0x115   :  { %799 = vst [vmem:[%s1188_s8 + $0x20] sm:$0xff] %v779_v36   ;;  %v587_v43 = vadd.f32 %v571_v39, %v300_v31  ;;  %v569_v32 = vadd.f32 %v1091_v38, %v546_v40  ;;  %v602_v44 = vmax.f32 %v586_v37, 0.0 }
 0x116   :  { %v600_v47 = vmax.f32 %v584_v41, 0.0 }
 0x117   :  { %v603_v45 = vmax.f32 %v587_v43, 0.0  ;;  %v585_v46 = vadd.f32 %v569_v32, %v298_v42 }
 0x119   :  { %v794_v48 = vpack.c.bf16 %v603_v45, %v602_v44  ;;  %v601_v33 = vmax.f32 %v585_v46, 0.0 }
 0x11b   :  { %802 = vst [vmem:[%s1188_s8 + $0x38] sm:$0xff] %v794_v48   ;;  %v789_v49 = vpack.c.bf16 %v601_v33, %v600_v47 }
 0x11d   :  { %801 = vst [vmem:[%s1188_s8 + $0x30] sm:$0xff] %v789_v49  }

// kernel: bottleneck_forward.4
= control target key start
LH: loop header
LB: loop body
LE: loop exit
PB: predicated region body
PF: predicated region fallthrough
CT: control target
= control target key end

     0   :  { %s4383_s15 = smov 0   ;;  %s4385_s16 = smov 0   ;;  %s4811_s0 = inlined_call_operand.vmem [shape: bf16[2,1,4,160,128], index: 0, kind: input, shape index: {}]   ;;  %s4812_s1 = inlined_call_operand.vmem [shape: bf16[9,128,128], index: 1, kind: input, shape index: {}]   ;;  %s4813_s2 = inlined_call_operand.vmem [shape: f32[1,128], index: 2, kind: input, shape index: {}]   ;;  %s4814_s3 = inlined_call_operand.vmem [shape: f32[1,128], index: 3, kind: input, shape index: {}]   ;;  %s4815_s4 = inlined_call_operand.vmem [shape: bf16[2,1,128,128], index: 4, kind: output, shape index: {}]  }
   0x1   :  { %s4387_s17 = smov 0  }
   0x2 LB: > { %s26_s18 = sadd.s32 1, %s4352_s16  ;;  %p3142_p0 = scmp.ge.s32.totalorder %s4356_s17, 1  ;;  %s4356_s17 = sphi %s4387_s17, %s14_s17   ;;  %s4352_s16 = sphi %s4385_s16, %s4817_s16   ;;  %s4348_s15 = sphi %s4383_s15, %s4816_s15  }
   0x3   : > { %p28_p1 = scmp.ge.s32.totalorder %s26_s18, 2  ;;  %p182_p2 = scmp.lt.s32.totalorder %s4356_s17, 3 }
   0x5   : > { %s4819_s18 = smov (%p28_p1, %s26_s18), 0  ;;  %p183_p3 = pnand %p3142_p0, %p182_p2 }
   0x6   : > { %v4187_v0 = vld [vmem:[%s4812_s1] sm:$0xff] (!%p183_p3)   ;;  %p216_p4 = scmp.lt.s32.totalorder (!%p183_p3), %s4348_s15, 1  ;;  %v4189_v2 = vld [vmem:[%s4812_s1 + $0x8] sm:$0xff] (!%p183_p3)   ;;  %v4191_v4 = vld [vmem:[%s4812_s1 + $0x10] sm:$0xff] (!%p183_p3)   ;;  %vm828_vm0 = vsmask.f32 (!%p183_p3), 7424 }
   0x7   : > { %186 = sbr.rel (%p183_p3) target bundleno = 403 (0x193), region = 36  ;;  %v4188_v1 = vld [vmem:[%s4812_s1 + $0x100] sm:$0xff] (!%p183_p3)   ;;  %3730 = vmatprep.subr.bf16.mxu1 (!%p183_p3), %v4187_v0  ;;  %v4190_v3 = vld [vmem:[%s4812_s1 + $0x108] sm:$0xff] (!%p183_p3)   ;;  %v4192_v5 = vld [vmem:[%s4812_s1 + $0x110] sm:$0xff] (!%p183_p3)  }
   0x8   : > { %3858 = vmatprep.subr.bf16.mxu0 (!%p183_p3), %v4188_v1  ;;  %3731 = vmatpush3.bf16.msra.mxu1 (!%p183_p3), %v4187_v0  ;;  %v4193_v6 = vld [vmem:[%s4812_s1 + $0x18] sm:$0xff] (!%p183_p3)   ;;  %v4195_v8 = vld [vmem:[%s4812_s1 + $0x20] sm:$0xff] (!%p183_p3)   ;;  %v4197_v10 = vld [vmem:[%s4812_s1 + $0x28] sm:$0xff] (!%p183_p3)  }
   0x9   : > { %3859 = vmatpush3.bf16.msra.mxu0 (!%p183_p3), %v4188_v1  ;;  %3732 = vmatprep.subr.bf16.mxu1 (!%p183_p3), %v4189_v2  ;;  %v4194_v7 = vld [vmem:[%s4812_s1 + $0x118] sm:$0xff] (!%p183_p3)   ;;  %v4196_v9 = vld [vmem:[%s4812_s1 + $0x120] sm:$0xff] (!%p183_p3)   ;;  %v4198_v11 = vld [vmem:[%s4812_s1 + $0x128] sm:$0xff] (!%p183_p3)  }
   0xa   : > { %3860 = vmatprep.subr.bf16.mxu0 (!%p183_p3), %v4190_v3  ;;  %v4199_v14 = vld [vmem:[%s4812_s1 + $0x30] sm:$0xff] (!%p183_p3)   ;;  %v4201_v16 = vld [vmem:[%s4812_s1 + $0x38] sm:$0xff] (!%p183_p3)   ;;  %v4206_v19 = vld [vmem:[%s4812_s1 + $0x40] sm:$0xff] (!%p183_p3)  }
   0xb   : > { %v4200_v15 = vld [vmem:[%s4812_s1 + $0x130] sm:$0xff] (!%p183_p3)   ;;  %v4202_v17 = vld [vmem:[%s4812_s1 + $0x138] sm:$0xff] (!%p183_p3)   ;;  %v4208_v20 = vld [vmem:[%s4812_s1 + $0x140] sm:$0xff] (!%p183_p3)  }
   0xc   : > { %3733 = vmatpush3.bf16.msra.mxu1 (!%p183_p3), %v4189_v2  ;;  %v4209_v22 = vld [vmem:[%s4812_s1 + $0x48] sm:$0xff] (!%p183_p3)   ;;  %v4214_v27 = vld [vmem:[%s4812_s1 + $0x50] sm:$0xff] (!%p183_p3)   ;;  %v4217_v30 = vld [vmem:[%s4812_s1 + $0x58] sm:$0xff] (!%p183_p3)  }
   0xd   : > { %3861 = vmatpush3.bf16.msra.mxu0 (!%p183_p3), %v4190_v3  ;;  %3734 = vmatprep.subr.bf16.mxu1 (!%p183_p3), %v4191_v4  ;;  %v4210_v23 = vld [vmem:[%s4812_s1 + $0x148] sm:$0xff] (!%p183_p3)   ;;  %v4216_v28 = vld [vmem:[%s4812_s1 + $0x150] sm:$0xff] (!%p183_p3)   ;;  %v4218_v31 = vld [vmem:[%s4812_s1 + $0x158] sm:$0xff] (!%p183_p3)  }
   0xe   : > { %s4821_s15 = smov (!%p216_p4, %s4348_s15), 1  ;;  %3862 = vmatprep.subr.bf16.mxu0 %v4192_v5  ;;  %v4222_v35 = vld [vmem:[%s4812_s1 + $0x60] sm:$0xff]   ;;  %v4225_v38 = vld [vmem:[%s4812_s1 + $0x68] sm:$0xff]   ;;  %v4230_v42 = vld [vmem:[%s4812_s1 + $0x70] sm:$0xff]  }
   0xf   : > { %s4162_s9 = smul.u32 320, %s4821_s15  ;;  %v4224_v37 = vld [vmem:[%s4812_s1 + $0x160] sm:$0xff]   ;;  %v4226_v39 = vld [vmem:[%s4812_s1 + $0x168] sm:$0xff]   ;;  %v4232_v49 = vld [vmem:[%s4812_s1 + $0x170] sm:$0xff]   ;;  %s3522_s22 = sshll.u32 %s4821_s15, 6 }
  0x10   : > { %3735 = vmatpush3.bf16.msra.mxu1 %v4191_v4  ;;  %v4233_v51 = vld [vmem:[%s4812_s1 + $0x78] sm:$0xff]   ;;  %v4239_v1 = vld [vmem:[%s4812_s1 + $0x80] sm:$0xff]   ;;  %s4770_s24 = scalar_lea.vmem %s4815_s4, %s3522_s22 }
  0x11   : > { %3863 = vmatpush3.bf16.msra.mxu0 %v4192_v5  ;;  %3736 = vmatprep.subr.bf16.mxu1 %v4193_v6  ;;  %s4437_s20 = scalar_lea.vmem %s4811_s0, %s4162_s9  ;;  %v4234_v54 = vld [vmem:[%s4812_s1 + $0x178] sm:$0xff]   ;;  %v4241_v3 = vld [vmem:[%s4812_s1 + $0x180] sm:$0xff]   ;;  %v4242_v5 = vld [vmem:[%s4812_s1 + $0x88] sm:$0xff]  }
  0x12   : > { %3864 = vmatprep.subr.bf16.mxu0 %v4194_v7  ;;  %v4203_v12 = vld [vmem:[%s4437_s20] sm:$0xff]   ;;  %v4204_v13 = vld [vmem:[%s4437_s20 + $0xf0] sm:$0xff]   ;;  %v4205_v18 = vld [vmem:[%s4437_s20 + $0x8] sm:$0xff]  }
  0x13   : > { %3746 = vmatprep.mubr.bf16.mxu1 %v4203_v12  ;;  %3874 = vmatprep.mubr.bf16.mxu0 %v4204_v13  ;;  %v4207_v21 = vld [vmem:[%s4437_s20 + $0xf8] sm:$0xff]   ;;  %v4211_v24 = vld [vmem:[%s4437_s20 + $0x10] sm:$0xff]   ;;  %v4212_v25 = vld [vmem:[%s4437_s20 + $0x100] sm:$0xff]  }
  0x14   : > { %3737 = vmatpush3.bf16.msra.mxu1 %v4193_v6  ;;  %v4213_v26 = vld [vmem:[%s4437_s20 + $0x18] sm:$0xff]   ;;  %v4215_v29 = vld [vmem:[%s4437_s20 + $0x108] sm:$0xff]   ;;  %v4219_v32 = vld [vmem:[%s4437_s20 + $0x20] sm:$0xff]  }
  0x15   : > { %3865 = vmatpush3.bf16.msra.mxu0 %v4194_v7  ;;  %3738 = vmatprep.subr.bf16.mxu1 %v4195_v8  ;;  %v4220_v33 = vld [vmem:[%s4437_s20 + $0x110] sm:$0xff]   ;;  %v4221_v34 = vld [vmem:[%s4437_s20 + $0x28] sm:$0xff]   ;;  %v4223_v36 = vld [vmem:[%s4437_s20 + $0x118] sm:$0xff]  }
  0x16   : > { %3866 = vmatprep.subr.bf16.mxu0 %v4196_v9  ;;  %v4227_v40 = vld [vmem:[%s4437_s20 + $0x30] sm:$0xff]   ;;  %v4228_v41 = vld [vmem:[%s4437_s20 + $0x120] sm:$0xff]   ;;  %v4237_v44 = vld [vmem:[%s4437_s20 + $0xa8] sm:$0xff]  }
  0x17   : > { %v4236_v43 = vld [vmem:[%s4437_s20 + $0xa0] sm:$0xff]   ;;  %v4229_v45 = vld [vmem:[%s4437_s20 + $0x38] sm:$0xff]   ;;  %v4231_v48 = vld [vmem:[%s4437_s20 + $0x128] sm:$0xff]   ;;  %v1733_v50 = vshll.u32 %v4237_v44, 16  ;;  %v1737_v57 = vshrl.u32 %v4237_v44, 16 }
  0x18   : > { %3739 = vmatpush3.bf16.msra.mxu1 %v4195_v8  ;;  %v1726_v46 = vshrl.u32 %v4236_v43, 16  ;;  %v1728_v47 = vshll.u32 %v4236_v43, 16  ;;  %v4240_v53 = vld [vmem:[%s4437_s20 + $0xb0] sm:$0xff]   ;;  %v4245_v61 = vld [vmem:[%s4437_s20 + $0xb8] sm:$0xff]   ;;  %v4248_v6 = vld [vmem:[%s4437_s20 + $0xc0] sm:$0xff]  }
  0x19   : > { %3867 = vmatpush3.bf16.msra.mxu0 %v4196_v9  ;;  %3740 = vmatprep.subr.bf16.mxu1 %v4197_v10  ;;  %v1735_v55 = vrot.slane %v1733_v50, 1  ;;  %v1741_v58 = vshll.u32 %v4240_v53, 16  ;;  %v4235_v59 = vld [vmem:[%s4437_s20 + $0x50] sm:$0xff]   ;;  %v1745_v62 = vshrl.u32 %v4240_v53, 16  ;;  %v4238_v0 = vld [vmem:[%s4437_s20 + $0x58] sm:$0xff]   ;;  %v1749_v4 = vshll.u32 %v4245_v61, 16 }
  0x1a   : > { %3868 = vmatprep.subr.bf16.mxu0 %v4198_v11  ;;  %v1730_v52 = vrot.slane %v1728_v47, 1  ;;  %v4243_v7 = vld [vmem:[%s4812_s1 + $0x188] sm:$0xff]   ;;  %v1757_v12 = vshll.u32 %v4248_v6, 16  ;;  %v4244_v13 = vld [vmem:[%s4437_s20 + $0x60] sm:$0xff]   ;;  %v4263_v50 = vld [vmem:[%s4812_s1 + $0xb0] sm:$0xff]  }
  0x1b   : > { %v1739_v63 = vor.u32 %v1737_v57, %v1735_v55  ;;  %v1743_v2 = vrot.slane %v1741_v58, 1  ;;  %v1751_v9 = vrot.slane %v1749_v4, 1  ;;  %v4259_v43 = vld [vmem:[%s4812_s1 + $0x1a8] sm:$0xff]  }
  0x1c   : > { %3741 = vmatpush3.bf16.msra.mxu1 %v4197_v10  ;;  %v1731_v56 = vor.u32 %v1730_v52, %v1726_v46  ;;  %v4269_v53 = vld [vmem:[%s4437_s20 + $0x8] sm:$0xff]  }
  0x1d   : > { %3869 = vmatpush3.bf16.msra.mxu0 %v4198_v11  ;;  %3742 = vmatprep.subr.bf16.mxu1 %v4199_v14  ;;  %v1747_v8 = vor.u32 %v1745_v62, %v1743_v2  ;;  %v1744_v10 = vsel %vm828_vm0, %v1739_v63, %v1743_v2  ;;  %v1753_v11 = vshrl.u32 %v4245_v61, 16  ;;  %v837_v61 = vshll.u32 %v4269_v53, 16 }
  0x1e   : > { %3870 = vmatprep.subr.bf16.mxu0 %v4200_v15  ;;  %v1736_v60 = vsel %vm828_vm0, %v1731_v56, %v1735_v55  ;;  %v841_v63 = vshrl.u32 %v4269_v53, 16 }
  0x20   : > { %3743 = vmatpush3.bf16.msra.mxu1 %v4199_v14  ;;  %v1752_v14 = vsel %vm828_vm0, %v1747_v8, %v1751_v9 }
  0x21   : > { %3871 = vmatpush3.bf16.msra.mxu0 %v4200_v15  ;;  %3744 = vmatprep.subr.bf16.mxu1 %v4201_v16  ;;  %v4253_v15 = vld [vmem:[%s4437_s20 + $0xc8] sm:$0xff]  }
  0x22   : > { %3872 = vmatprep.subr.bf16.mxu0 %v4202_v17 }
  0x24   : > { %3745 = vmatpush3.bf16.msra.mxu1 %v4201_v16  ;;  %v1761_v16 = vshrl.u32 %v4248_v6, 16 }
  0x25   : > { %3873 = vmatpush3.bf16.msra.mxu0 %v4202_v17  ;;  %3762 = vmatprep.subr.bf16.mxu1 %v4206_v19  ;;  %v4246_v17 = vld [vmem:[%s4437_s20 + $0x68] sm:$0xff]  }
  0x26   : > { %3890 = vmatprep.subr.bf16.mxu0 %v4208_v20 }
  0x27   : > { %3747 = vmatmul.mubr.bf16.vlgmr.msra.gmra.mrb[0].mxu1 %v4205_v18  ;;  %v4247_v18 = vld [vmem:[%s4812_s1 + $0x90] sm:$0xff]  }
  0x28   : > { %3875 = vmatmul.mubr.bf16.vlgmr.msra.gmra.mrb[0].mxu0 %v4207_v21  ;;  %3763 = vmatpush3.bf16.msra.mxu1 %v4206_v19  ;;  %v1755_v19 = vor.u32 %v1753_v11, %v1751_v9  ;;  %v4249_v21 = vld [vmem:[%s4812_s1 + $0x190] sm:$0xff]   ;;  %v4272_v11 = vld [vmem:[%s4812_s1 + $0xc0] sm:$0xff]  }
  0x29   : > { %3891 = vmatpush3.bf16.msra.mxu0 %v4208_v20  ;;  %3764 = vmatprep.subr.bf16.mxu1 %v4209_v22  ;;  %v1759_v20 = vrot.slane %v1757_v12, 1  ;;  %v4277_v12 = vld [vmem:[%s4437_s20 + $0x18] sm:$0xff]  }
  0x2a   : > { %3892 = vmatprep.subr.bf16.mxu0 %v4210_v23  ;;  %3750 = vmatprep.mubr.bf16.mxu1 %v4211_v24  ;;  %v4256_v24 = vld [vmem:[%s4437_s20 + $0xd0] sm:$0xff]  }
  0x2b   : > { %3878 = vmatprep.mubr.bf16.mxu0 %v4212_v25  ;;  %v4251_v25 = vld [vmem:[%s4812_s1 + $0x198] sm:$0xff]  }
  0x2c   : > { %3765 = vmatpush3.bf16.msra.mxu1 %v4209_v22  ;;  %v1765_v22 = vshll.u32 %v4253_v15, 16 }
  0x2d   : > { %3893 = vmatpush3.bf16.msra.mxu0 %v4210_v23  ;;  %3766 = vmatprep.subr.bf16.mxu1 %v4214_v27  ;;  %v4250_v23 = vld [vmem:[%s4812_s1 + $0x98] sm:$0xff]  }
  0x2e   : > { %3894 = vmatprep.subr.bf16.mxu0 %v4216_v28 }
  0x2f   : > { %3751 = vmatmul.mubr.bf16.gmra.mrb[4].mxu1 %v4213_v26  ;;  %v1763_v26 = vor.u32 %v1761_v16, %v1759_v20 }
  0x30   : > { %3879 = vmatmul.mubr.bf16.gmra.mrb[4].mxu0 %v4215_v29  ;;  %3767 = vmatpush3.bf16.msra.mxu1 %v4214_v27  ;;  %v1767_v27 = vrot.slane %v1765_v22, 1  ;;  %v1769_v29 = vshrl.u32 %v4253_v15, 16  ;;  %v4275_v15 = vld [vmem:[%s4812_s1 + $0xc8] sm:$0xff]  }
  0x31   : > { %3895 = vmatpush3.bf16.msra.mxu0 %v4216_v28  ;;  %3768 = vmatprep.subr.bf16.mxu1 %v4217_v30  ;;  %v1760_v28 = vsel %vm828_vm0, %v1755_v19, %v1759_v20  ;;  %v857_v19 = vshrl.u32 %v4277_v12, 16 }
  0x32   : > { %3896 = vmatprep.subr.bf16.mxu0 %v4218_v31  ;;  %3754 = vmatprep.mubr.bf16.mxu1 %v4219_v32  ;;  %v1768_v32 = vsel %vm828_vm0, %v1763_v26, %v1767_v27  ;;  %v4280_v26 = vld [vmem:[%s4812_s1 + $0xd0] sm:$0xff]  }
  0x33   : > { %3882 = vmatprep.mubr.bf16.mxu0 %v4220_v33  ;;  %v4261_v33 = vld [vmem:[%s4437_s20 + $0xd8] sm:$0xff]  }
  0x34   : > { %3769 = vmatpush3.bf16.msra.mxu1 %v4217_v30  ;;  %v1773_v30 = vshll.u32 %v4256_v24, 16  ;;  %v1785_v47 = vshrl.u32 %v4261_v33, 16 }
  0x35   : > { %3897 = vmatpush3.bf16.msra.mxu0 %v4218_v31  ;;  %3770 = vmatprep.subr.bf16.mxu1 %v4222_v35  ;;  %v4252_v31 = vld [vmem:[%s4437_s20 + $0x70] sm:$0xff]  }
  0x36   : > { %3898 = vmatprep.subr.bf16.mxu0 %v4224_v37 }
  0x37   : > { %3755 = vmatmul.mubr.bf16.gmra.mrb[8].mxu1 %v4221_v34  ;;  %v1777_v34 = vshrl.u32 %v4256_v24, 16 }
  0x38   : > { %3883 = vmatmul.mubr.bf16.gmra.mrb[8].mxu0 %v4223_v36  ;;  %3771 = vmatpush3.bf16.msra.mxu1 %v4222_v35  ;;  %v4254_v35 = vld [vmem:[%s4437_s20 + $0x78] sm:$0xff]   ;;  %v4255_v36 = vld [vmem:[%s4812_s1 + $0xa0] sm:$0xff]  }
  0x39   : > { %3899 = vmatpush3.bf16.msra.mxu0 %v4224_v37  ;;  %3772 = vmatprep.subr.bf16.mxu1 %v4225_v38  ;;  %v1771_v37 = vor.u32 %v1769_v29, %v1767_v27 }
  0x3a   : > { %3900 = vmatprep.subr.bf16.mxu0 %v4226_v39  ;;  %3758 = vmatprep.mubr.bf16.mxu1 %v4227_v40  ;;  %v1781_v40 = vshll.u32 %v4261_v33, 16  ;;  %v4283_v33 = vld [vmem:[%s4812_s1 + $0xd8] sm:$0xff]  }
  0x3b   : > { %3886 = vmatprep.mubr.bf16.mxu0 %v4228_v41  ;;  %v4258_v41 = vld [vmem:[%s4812_s1 + $0xa8] sm:$0xff]  }
  0x3c   : > { %3773 = vmatpush3.bf16.msra.mxu1 %v4225_v38  ;;  %v1775_v38 = vrot.slane %v1773_v30, 1  ;;  %v4285_v30 = vld [vmem:[%s4437_s20 + $0x28] sm:$0xff]  }
  0x3d   : > { %3901 = vmatpush3.bf16.msra.mxu0 %v4226_v39  ;;  %3774 = vmatprep.subr.bf16.mxu1 %v4230_v42  ;;  %v4257_v39 = vld [vmem:[%s4812_s1 + $0x1a0] sm:$0xff]  }
  0x3e   : > { %3902 = vmatprep.subr.bf16.mxu0 %v4232_v49  ;;  %v1779_v44 = vor.u32 %v1777_v34, %v1775_v38  ;;  %v1776_v46 = vsel %vm828_vm0, %v1771_v37, %v1775_v38  ;;  %v873_v37 = vshrl.u32 %v4285_v30, 16 }
  0x3f   : > { %3759 = vmatmul.mubr.bf16.gmra.mrb[12].mxu1 %v4229_v45  ;;  %v1783_v45 = vrot.slane %v1781_v40, 1 }
  0x40   : > { %3887 = vmatmul.mubr.bf16.gmra.mrb[12].mxu0 %v4231_v48  ;;  %3775 = vmatpush3.bf16.msra.mxu1 %v4230_v42  ;;  %v4264_v42 = vld [vmem:[%s4437_s20 + $0xe0] ss:$0 sps:$4 sm:$0x11]  }
  0x41   : > { %3903 = vmatpush3.bf16.msra.mxu0 %v4232_v49  ;;  %3776 = vmatprep.subr.bf16.mxu1 %v4233_v51  ;;  %v1789_v48 = vshll.u32 %v4264_v42, 16  ;;  %v4260_v49 = vld [vmem:[%s4437_s20 + $0x80] sm:$0xff]   ;;  %v1784_v52 = vsel %vm828_vm0, %v1779_v44, %v1783_v45  ;;  %v1787_v55 = vor.u32 %v1785_v47, %v1783_v45 }
  0x42   : > { %3904 = vmatprep.subr.bf16.mxu0 %v4234_v54  ;;  %3778 = vmatprep.mubr.bf16.mxu1 %v4235_v59  ;;  %v4271_v59 = vld [vmem:[%s4437_s20 + $0x10] sm:$0xff]   ;;  %v4288_v44 = vld [vmem:[%s4812_s1 + $0xe0] sm:$0xff]  }
  0x43   : > { %3906 = vmatprep.mubr.bf16.mxu0 %v1736_v60  ;;  %v1791_v56 = vrot.slane %v1789_v48, 1  ;;  %v4265_v60 = vld [vmem:[%s4812_s1 + $0x1b0] sm:$0xff]   ;;  %v849_v8 = vshrl.u32 %v4271_v59, 16  ;;  %v4293_v48 = vld [vmem:[%s4437_s20 + $0x38] sm:$0xff]  }
  0x44   : > { %3777 = vmatpush3.bf16.msra.mxu1 %v4233_v51  ;;  %v4268_v51 = vld [vmem:[%s4437_s20] sm:$0xff]   ;;  %v885_v53 = vshll.u32 %v4293_v48, 16 }
  0x45   : > { %3905 = vmatpush3.bf16.msra.mxu0 %v4234_v54  ;;  %3794 = vmatprep.subr.bf16.mxu1 %v4239_v1  ;;  %v4262_v54 = vld [vmem:[%s4437_s20 + $0x88] sm:$0xff]   ;;  %v830_v57 = vshrl.u32 %v4268_v51, 16  ;;  %v832_v58 = vshll.u32 %v4268_v51, 16  ;;  %v1792_v2 = vsel %vm828_vm0, %v1787_v55, %v1791_v56  ;;  %v4289_v51 = vld [vmem:[%s4437_s20 + $0x30] sm:$0xff]   ;;  %v889_v55 = vshrl.u32 %v4293_v48, 16 }
  0x46   : > { %3922 = vmatprep.subr.bf16.mxu0 %v4241_v3 }
  0x47   : > { %3779 = vmatmul.mubr.bf16.vlgmr.msra.gmra.mrb[0].mxu1 %v4238_v0  ;;  %v834_v62 = vrot.slane %v832_v58, 1  ;;  %v839_v0 = vrot.slane %v837_v61, 1  ;;  %v887_v58 = vrot.slane %v885_v53, 1  ;;  %v4294_v61 = vld [vmem:[%s4437_s20 + $0x38] sm:$0xff]  }
  0x48   : > { %3907 = vmatmul.mubr.bf16.vlgmr.msra.gmra.mrb[0].mxu0 %v1744_v10  ;;  %3795 = vmatpush3.bf16.msra.mxu1 %v4239_v1  ;;  %v845_v1 = vshll.u32 %v4271_v59, 16  ;;  %v4292_v59 = vld [vmem:[%s4812_s1 + $0x1e8] sm:$0xff]  }
  0x49   : > { %3923 = vmatpush3.bf16.msra.mxu0 %v4241_v3  ;;  %3796 = vmatprep.subr.bf16.mxu1 %v4242_v5  ;;  %v4266_v3 = vld [vmem:[%s4812_s1 + $0xb8] sm:$0xff]   ;;  %v835_v4 = vor.u32 %v834_v62, %v830_v57  ;;  %v843_v9 = vor.u32 %v841_v63, %v839_v0  ;;  %v4291_v57 = vld [vmem:[%s4812_s1 + $0xe8] sm:$0xff]   ;;  %v891_v62 = vor.u32 %v889_v55, %v887_v58 }
  0x4a   : > { %3924 = vmatprep.subr.bf16.mxu0 %v4243_v7  ;;  %3782 = vmatprep.mubr.bf16.mxu1 %v4244_v13  ;;  %v847_v10 = vrot.slane %v845_v1, 1  ;;  %v4273_v13 = vld [vmem:[%s4437_s20 + $0x10] sm:$0xff]  }
  0x4b   : > { %3910 = vmatprep.mubr.bf16.mxu0 %v1752_v14  ;;  %v840_v6 = vsel %vm828_vm0, %v835_v4, %v839_v0  ;;  %v4274_v14 = vld [vmem:[%s4812_s1 + $0x1c0] sm:$0xff]   ;;  %v4296_v0 = vld [vmem:[%s4812_s1 + $0xf0] sm:$0xff]   ;;  %v4299_v4 = vld [vmem:[%s4812_s1 + $0xf8] sm:$0xff]  }
  0x4c   : > { %3797 = vmatpush3.bf16.msra.mxu1 %v4242_v5  ;;  %v4267_v5 = vld [vmem:[%s4812_s1 + $0x1b8] sm:$0xff]   ;;  %v851_v16 = vor.u32 %v849_v8, %v847_v10  ;;  %v848_v20 = vsel %vm828_vm0, %v843_v9, %v847_v10  ;;  %v4298_v1 = vld [vmem:[%s4812_s1 + $0x1f0] sm:$0xff]   ;;  %v4305_v8 = vld [vmem:[%s4812_s1 + $0x200] sm:$0xff]  }
  0x4d   : > { %3925 = vmatpush3.bf16.msra.mxu0 %v4243_v7  ;;  %3798 = vmatprep.subr.bf16.mxu1 %v4247_v18  ;;  %v4270_v7 = vld [vmem:[%s4437_s20 + $0x8] sm:$0xff]   ;;  %v4304_v10 = vld [vmem:[%s4437_s20 + $0x60] sm:$0xff]  }
  0x4e   : > { %3926 = vmatprep.subr.bf16.mxu0 %v4249_v21  ;;  %v4303_v9 = vld [vmem:[%s4437_s20 + $0xa8] sm:$0xff]  }
  0x4f   : > { %3783 = vmatmul.mubr.bf16.gmra.mrb[4].mxu1 %v4246_v17  ;;  %v853_v17 = vshll.u32 %v4277_v12, 16  ;;  %v4307_v12 = vld [vmem:[%s4437_s20 + $0xb0] sm:$0xff]  }
  0x50   : > { %3911 = vmatmul.mubr.bf16.gmra.mrb[4].mxu0 %v1760_v28  ;;  %3799 = vmatpush3.bf16.msra.mxu1 %v4247_v18  ;;  %v4279_v18 = vld [vmem:[%s4437_s20 + $0x20] sm:$0xff]  }
  0x51   : > { %3927 = vmatpush3.bf16.msra.mxu0 %v4249_v21  ;;  %3800 = vmatprep.subr.bf16.mxu1 %v4250_v23  ;;  %v4276_v21 = vld [vmem:[%s4812_s1 + $0x1c8] sm:$0xff]   ;;  %v855_v22 = vrot.slane %v853_v17, 1  ;;  %v861_v24 = vshll.u32 %v4279_v18, 16  ;;  %v865_v29 = vshrl.u32 %v4279_v18, 16  ;;  %v4312_v17 = vld [vmem:[%s4812_s1 + $0x218] sm:$0xff]   ;;  %v4313_v18 = vld [vmem:[%s4437_s20 + $0xc0] sm:$0xff]  }
  0x52   : > { %3928 = vmatprep.subr.bf16.mxu0 %v4251_v25  ;;  %3786 = vmatprep.mubr.bf16.mxu1 %v4252_v31  ;;  %v4281_v31 = vld [vmem:[%s4437_s20 + $0x20] sm:$0xff]  }
  0x53   : > { %3914 = vmatprep.mubr.bf16.mxu0 %v1768_v32  ;;  %v859_v27 = vor.u32 %v857_v19, %v855_v22  ;;  %v863_v28 = vrot.slane %v861_v24, 1  ;;  %v4282_v32 = vld [vmem:[%s4812_s1 + $0x1d0] sm:$0xff]   ;;  %v4314_v19 = vld [vmem:[%s4437_s20 + $0x78] sm:$0xff]  }
  0x54   : > { %3801 = vmatpush3.bf16.msra.mxu1 %v4250_v23  ;;  %v4278_v23 = vld [vmem:[%s4437_s20 + $0x18] sm:$0xff]   ;;  %v4326_v24 = vld [vmem:[%s4437_s20 + $0x10] sm:$0xff]  }
  0x55   : > { %3929 = vmatpush3.bf16.msra.mxu0 %v4251_v25  ;;  %3802 = vmatprep.subr.bf16.mxu1 %v4255_v36  ;;  %v856_v25 = vsel %vm828_vm0, %v851_v16, %v855_v22  ;;  %v867_v34 = vor.u32 %v865_v29, %v863_v28  ;;  %v864_v38 = vsel %vm828_vm0, %v859_v27, %v863_v28  ;;  %v4310_v16 = vld [vmem:[%s4437_s20 + $0x70] sm:$0xff]   ;;  %v4325_v22 = vld [vmem:[%s4437_s20 + $0x8] sm:$0xff]   ;;  %v2631_v53 = vshrl.u32 %v4326_v24, 16 }
  0x56   : > { %3930 = vmatprep.subr.bf16.mxu0 %v4257_v39  ;;  %v4328_v27 = vld [vmem:[%s4437_s20 + $0x30] sm:$0xff]   ;;  %v4318_v28 = vld [vmem:[%s4812_s1 + $0x228] sm:$0xff]  }
  0x57   : > { %3787 = vmatmul.mubr.bf16.gmra.mrb[8].mxu1 %v4254_v35  ;;  %v869_v35 = vshll.u32 %v4285_v30, 16  ;;  %v4319_v29 = vld [vmem:[%s4437_s20 + $0xd0] sm:$0xff]   ;;  %v4320_v30 = vld [vmem:[%s4437_s20 + $0x88] sm:$0xff]  }
  0x58   : > { %3915 = vmatmul.mubr.bf16.gmra.mrb[8].mxu0 %v1776_v46  ;;  %3803 = vmatpush3.bf16.msra.mxu1 %v4255_v36  ;;  %v4287_v36 = vld [vmem:[%s4437_s20 + $0x30] sm:$0xff]  }
  0x59   : > { %3931 = vmatpush3.bf16.msra.mxu0 %v4257_v39  ;;  %3804 = vmatprep.subr.bf16.mxu1 %v4258_v41  ;;  %v4284_v39 = vld [vmem:[%s4812_s1 + $0x1d8] sm:$0xff]   ;;  %v871_v40 = vrot.slane %v869_v35, 1  ;;  %v877_v42 = vshll.u32 %v4287_v36, 16  ;;  %v881_v47 = vshrl.u32 %v4287_v36, 16 }
  0x5a   : > { %3932 = vmatprep.subr.bf16.mxu0 %v4259_v43  ;;  %3790 = vmatprep.mubr.bf16.mxu1 %v4260_v49  ;;  %v4290_v49 = vld [vmem:[%s4812_s1 + $0x1e0] sm:$0xff]   ;;  %v4330_v35 = vld [vmem:[%s4437_s20 + $0x38] sm:$0xff]  }
  0x5b   : > { %3918 = vmatprep.mubr.bf16.mxu0 %v1784_v52  ;;  %v875_v45 = vor.u32 %v873_v37, %v871_v40  ;;  %v879_v46 = vrot.slane %v877_v42, 1  ;;  %v4331_v42 = vld [vmem:[%s4437_s20 + $0x20] sm:$0xff]  }
  0x5c   : > { %3805 = vmatpush3.bf16.msra.mxu1 %v4258_v41  ;;  %v4286_v41 = vld [vmem:[%s4437_s20 + $0x28] sm:$0xff]  }
  0x5d   : > { %3933 = vmatpush3.bf16.msra.mxu0 %v4259_v43  ;;  %3806 = vmatprep.subr.bf16.mxu1 %v4263_v50  ;;  %v872_v43 = vsel %vm828_vm0, %v867_v34, %v871_v40  ;;  %v883_v52 = vor.u32 %v881_v47, %v879_v46  ;;  %v2627_v34 = vshll.u32 %v4326_v24, 16  ;;  %v4323_v40 = vld [vmem:[%s4812_s1 + $0x230] sm:$0xff]  }
  0x5e   : > { %3934 = vmatprep.subr.bf16.mxu0 %v4265_v60  ;;  %v4322_v47 = vld [vmem:[%s4437_s20 + $0x90] sm:$0xff]  }
  0x5f   : > { %3791 = vmatmul.mubr.bf16.gmra.mrb[12].mxu1 %v4262_v54  ;;  %v880_v54 = vsel %vm828_vm0, %v875_v45, %v879_v46  ;;  %v2629_v45 = vrot.slane %v2627_v34, 1  ;;  %v2667_v46 = vshll.u32 %v4330_v35, 16 }
  0x60   : > { %3919 = vmatmul.mubr.bf16.gmra.mrb[12].mxu0 %v1792_v2  ;;  %3807 = vmatpush3.bf16.msra.mxu1 %v4263_v50  ;;  %v4295_v50 = vld [vmem:[%s4437_s20 + $0x40] ss:$0 sps:$4 sm:$0x11]  }
  0x61   : > { %3935 = vmatpush3.bf16.msra.mxu0 %v4265_v60  ;;  %3808 = vmatprep.subr.bf16.mxu1 %v4266_v3  ;;  %v893_v56 = vshll.u32 %v4295_v50, 16  ;;  %v888_v60 = vsel %vm828_vm0, %v883_v52, %v887_v58  ;;  %v4297_v2 = vld [vmem:[%s4437_s20 + $0x40] sm:$0xff]   ;;  %v2663_v50 = vshrl.u32 %v4328_v27, 16  ;;  %v4324_v52 = vld [vmem:[%s4812_s1 + $0x238] sm:$0xff]  }
  0x62   : > { %3936 = vmatprep.subr.bf16.mxu0 %v4267_v5  ;;  %3810 = vmatprep.mubr.bf16.mxu1 %v840_v6  ;;  %v4301_v6 = vld [vmem:[%s4437_s20 + $0xa0] sm:$0xff]  }
  0x63   : > { %3938 = vmatprep.mubr.bf16.mxu0 %v4270_v7  ;;  %v895_v63 = vrot.slane %v893_v56, 1  ;;  %v4302_v7 = vld [vmem:[%s4437_s20 + $0x58] sm:$0xff]  }
  0x64   : > { %3809 = vmatpush3.bf16.msra.mxu1 %v4266_v3 }
  0x65   : > { %3937 = vmatpush3.bf16.msra.mxu0 %v4267_v5  ;;  %3826 = vmatprep.subr.bf16.mxu1 %v4272_v11  ;;  %v896_v3 = vsel %vm828_vm0, %v891_v62, %v895_v63  ;;  %v4300_v5 = vld [vmem:[%s4812_s1 + $0x1f8] sm:$0xff]   ;;  %v4333_v63 = vld [vmem:[%s4437_s20 + $0x48] ss:$0 sps:$4 sm:$0x11]  }
  0x66   : > { %3954 = vmatprep.subr.bf16.mxu0 %v4274_v14 }
  0x67   : > { %3811 = vmatmul.mubr.bf16.vlgmr.msra.gmra.mrb[0].mxu1 %v848_v20  ;;  %v4317_v20 = vld [vmem:[%s4812_s1 + $0x220] sm:$0xff]  }
  0x68   : > { %3939 = vmatmul.mubr.bf16.vlgmr.msra.gmra.mrb[0].mxu0 %v4273_v13  ;;  %3827 = vmatpush3.bf16.msra.mxu1 %v4272_v11  ;;  %v4306_v11 = vld [vmem:[%s4812_s1 + $0x208] sm:$0xff]  }
  0x69   : > { %3955 = vmatpush3.bf16.msra.mxu0 %v4274_v14  ;;  %3828 = vmatprep.subr.bf16.mxu1 %v4275_v15  ;;  %v4308_v13 = vld [vmem:[%s4437_s20 + $0x68] sm:$0xff]   ;;  %v4311_v14 = vld [vmem:[%s4812_s1 + $0x210] sm:$0xff]  }
  0x6a   : > { %3956 = vmatprep.subr.bf16.mxu0 %v4276_v21  ;;  %3814 = vmatprep.mubr.bf16.mxu1 %v856_v25  ;;  %v2622_v25 = vshll.u32 %v4325_v22, 16 }
  0x6b   : > { %3942 = vmatprep.mubr.bf16.mxu0 %v4278_v23  ;;  %v4316_v23 = vld [vmem:[%s4437_s20 + $0x80] sm:$0xff]  }
  0x6c   : > { %3829 = vmatpush3.bf16.msra.mxu1 %v4275_v15  ;;  %v4309_v15 = vld [vmem:[%s4437_s20 + $0xb8] sm:$0xff]  }
  0x6d   : > { %3957 = vmatpush3.bf16.msra.mxu0 %v4276_v21  ;;  %3830 = vmatprep.subr.bf16.mxu1 %v4280_v26  ;;  %v4315_v21 = vld [vmem:[%s4437_s20 + $0xc8] sm:$0xff]  }
  0x6e   : > { %3958 = vmatprep.subr.bf16.mxu0 %v4282_v32 }
  0x6f   : > { %3815 = vmatmul.mubr.bf16.gmra.mrb[4].mxu1 %v864_v38  ;;  %v2659_v38 = vshll.u32 %v4328_v27, 16 }
  0x70   : > { %3943 = vmatmul.mubr.bf16.gmra.mrb[4].mxu0 %v4281_v31  ;;  %3831 = vmatpush3.bf16.msra.mxu1 %v4280_v26  ;;  %v4327_v26 = vld [vmem:[%s4437_s20 + $0x28] sm:$0xff]  }
  0x71   : > { %3959 = vmatpush3.bf16.msra.mxu0 %v4282_v32  ;;  %3832 = vmatprep.subr.bf16.mxu1 %v4283_v33  ;;  %v2651_v31 = vshll.u32 %v4327_v26, 16  ;;  %v2620_v32 = vshrl.u32 %v4325_v22, 16  ;;  %v2655_v37 = vshrl.u32 %v4327_v26, 16 }
  0x72   : > { %3960 = vmatprep.subr.bf16.mxu0 %v4284_v39  ;;  %3818 = vmatprep.mubr.bf16.mxu1 %v872_v43  ;;  %v4321_v43 = vld [vmem:[%s4437_s20 + $0xd8] sm:$0xff]  }
  0x73   : > { %3946 = vmatprep.mubr.bf16.mxu0 %v4286_v41  ;;  %v4704_v36 = vrot.slane %v2651_v31, 1  ;;  %v4332_v41 = vld [vmem:[%s4437_s20 + $0x40] sm:$0xff]  }
  0x74   : > { %3833 = vmatpush3.bf16.msra.mxu1 %v4283_v33  ;;  %v2624_v33 = vrot.slane %v2622_v25, 1  ;;  %v2675_v55 = vshll.u32 %v4332_v41, 16 }
  0x75   : > { %3961 = vmatpush3.bf16.msra.mxu0 %v4284_v39  ;;  %3834 = vmatprep.subr.bf16.mxu1 %v4288_v44  ;;  %v4329_v39 = vld [vmem:[%s4437_s20 + $0x18] sm:$0xff]   ;;  %v2657_v48 = vor.u32 %v2655_v37, %v4704_v36 }
  0x76   : > { %3962 = vmatprep.subr.bf16.mxu0 %v4290_v49  ;;  %v2639_v56 = vshrl.u32 %v4329_v39, 16 }
  0x77   : > { %3819 = vmatmul.mubr.bf16.gmra.mrb[8].mxu1 %v880_v54  ;;  %v2671_v54 = vshrl.u32 %v4330_v35, 16 }
  0x78   : > { %3947 = vmatmul.mubr.bf16.gmra.mrb[8].mxu0 %v4289_v51  ;;  %3835 = vmatpush3.bf16.msra.mxu1 %v4288_v44  ;;  %v2625_v44 = vor.u32 %v2624_v33, %v2620_v32  ;;  %v2635_v51 = vshll.u32 %v4329_v39, 16 }
  0x79   : > { %3963 = vmatpush3.bf16.msra.mxu0 %v4290_v49  ;;  %3836 = vmatprep.subr.bf16.mxu1 %v4291_v57  ;;  %v2661_v49 = vrot.slane %v2659_v38, 1 }
  0x7a   : > { %3964 = vmatprep.subr.bf16.mxu0 %v4292_v59  ;;  %3822 = vmatprep.mubr.bf16.mxu1 %v888_v60  ;;  %v2630_v58 = vsel %vm828_vm0, %v2625_v44, %v2629_v45  ;;  %v2637_v62 = vrot.slane %v2635_v51, 1 }
  0x7b   : > { %3950 = vmatprep.mubr.bf16.mxu0 %v4294_v61  ;;  %v2662_v60 = vsel %vm828_vm0, %v2657_v48, %v2661_v49  ;;  %v2665_v61 = vor.u32 %v2663_v50, %v2661_v49  ;;  %v4743_v49 = vld [vmem:[%s4813_s2] ss:$0 sm:$0xff] }
  0x7c   : > { %3837 = vmatpush3.bf16.msra.mxu1 %v4291_v57  ;;  %v2643_v57 = vshll.u32 %v4331_v42, 16 }
  0x7d   : > { %3965 = vmatpush3.bf16.msra.mxu0 %v4292_v59  ;;  %3838 = vmatprep.subr.bf16.mxu1 %v4296_v0  ;;  %v2669_v59 = vrot.slane %v2667_v46, 1 }
  0x7e   : > { %3966 = vmatprep.subr.bf16.mxu0 %v4298_v1 }
  0x7f   : > { %3823 = vmatmul.mubr.bf16.gmra.mrb[12].mxu1 %v896_v3  ;;  %v2641_v3 = vor.u32 %v2639_v56, %v2637_v62 }
  0x80   : > { %3951 = vmatmul.mubr.bf16.gmra.mrb[12].mxu0 %v4297_v2  ;;  %3839 = vmatpush3.bf16.msra.mxu1 %v4296_v0  ;;  %v2633_v0 = vor.u32 %v2631_v53, %v2629_v45  ;;  %v2677_v2 = vrot.slane %v2675_v55, 1  ;;  %v4748_v55 = vld [vmem:[%s4814_s3] ss:$0 sm:$0xff] }
  0x81   : > { %3967 = vmatpush3.bf16.msra.mxu0 %v4298_v1  ;;  %3840 = vmatprep.subr.bf16.mxu1 %v4299_v4  ;;  %v2673_v1 = vor.u32 %v2671_v54, %v2669_v59 }
  0x82   : > { %3968 = vmatprep.subr.bf16.mxu0 %v4300_v5  ;;  %3842 = vmatprep.mubr.bf16.mxu1 %v4301_v6  ;;  %v2679_v6 = vshrl.u32 %v4332_v41, 16 }
  0x83   : > { %3970 = vmatprep.mubr.bf16.mxu0 %v4302_v7  ;;  %v2683_v7 = vshll.u32 %v4333_v63, 16 }
  0x84   : > { %3841 = vmatpush3.bf16.msra.mxu1 %v4299_v4  ;;  %v2645_v4 = vrot.slane %v2643_v57, 1 }
  0x85   : > { %3969 = vmatpush3.bf16.msra.mxu0 %v4300_v5  ;;  %4018 = vmatprep.subr.bf16.mxu1 %v4305_v8  ;;  %v2670_v5 = vsel %vm828_vm0, %v2665_v61, %v2669_v59 }
  0x86   : > { %3986 = vmatprep.subr.bf16.mxu0 %v4305_v8 }
  0x87   : > { %3843 = vmatmul.mubr.bf16.vlgmr.msra.gmra.mrb[0].mxu1 %v4303_v9  ;;  %v2678_v9 = vsel %vm828_vm0, %v2673_v1, %v2677_v2 }
  0x88   : > { %3971 = vmatmul.mubr.bf16.vlgmr.msra.gmra.mrb[0].mxu0 %v4304_v10  ;;  %4026 = vmatpush3.bf16.msra.mxu1 %v4305_v8  ;;  %v2647_v10 = vshrl.u32 %v4331_v42, 16 }
  0x89   : > { %3987 = vmatpush3.bf16.msra.mxu0 %v4305_v8  ;;  %4019 = vmatprep.subr.bf16.mxu1 %v4306_v11  ;;  %v2638_v8 = vsel %vm828_vm0, %v2633_v0, %v2637_v62 }
  0x8a   : > { %3988 = vmatprep.subr.bf16.mxu0 %v4306_v11  ;;  %3846 = vmatprep.mubr.bf16.mxu1 %v4307_v12  ;;  %v2681_v12 = vor.u32 %v2679_v6, %v2677_v2 }
  0x8b   : > { %3974 = vmatprep.mubr.bf16.mxu0 %v4308_v13  ;;  %v2685_v13 = vrot.slane %v2683_v7, 1 }
  0x8c   : > { %4027 = vmatpush3.bf16.msra.mxu1 %v4306_v11 }
  0x8d   : > { %3989 = vmatpush3.bf16.msra.mxu0 %v4306_v11  ;;  %4020 = vmatprep.subr.bf16.mxu1 %v4311_v14  ;;  %v2646_v11 = vsel %vm828_vm0, %v2641_v3, %v2645_v4 }
  0x8e   : > { %3990 = vmatprep.subr.bf16.mxu0 %v4311_v14 }
  0x8f   : > { %3847 = vmatmul.mubr.bf16.gmra.mrb[4].mxu1 %v4309_v15  ;;  %v2686_v15 = vsel %vm828_vm0, %v2681_v12, %v2685_v13 }
  0x90   : > { %3975 = vmatmul.mubr.bf16.gmra.mrb[4].mxu0 %v4310_v16  ;;  %4028 = vmatpush3.bf16.msra.mxu1 %v4311_v14 }
  0x91   : > { %3991 = vmatpush3.bf16.msra.mxu0 %v4311_v14  ;;  %4021 = vmatprep.subr.bf16.mxu1 %v4312_v17  ;;  %v2649_v14 = vor.u32 %v2647_v10, %v2645_v4 }
  0x92   : > { %3992 = vmatprep.subr.bf16.mxu0 %v4312_v17  ;;  %3850 = vmatprep.mubr.bf16.mxu1 %v4313_v18 }
  0x93   : > { %3978 = vmatprep.mubr.bf16.mxu0 %v4314_v19  ;;  %v2654_v16 = vsel %vm828_vm0, %v2649_v14, %v4704_v36 }
  0x94   : > { %4029 = vmatpush3.bf16.msra.mxu1 %v4312_v17 }
  0x95   : > { %3993 = vmatpush3.bf16.msra.mxu0 %v4312_v17  ;;  %4022 = vmatprep.subr.bf16.mxu1 %v4317_v20 }
  0x96   : > { %3994 = vmatprep.subr.bf16.mxu0 %v4317_v20 }
  0x97   : > { %3851 = vmatmul.mubr.bf16.gmra.mrb[8].mxu1 %v4315_v21 }
  0x98   : > { %3979 = vmatmul.mubr.bf16.gmra.mrb[8].mxu0 %v4316_v23  ;;  %4030 = vmatpush3.bf16.msra.mxu1 %v4317_v20 }
  0x99   : > { %3995 = vmatpush3.bf16.msra.mxu0 %v4317_v20  ;;  %4023 = vmatprep.subr.bf16.mxu1 %v4318_v28 }
  0x9a   : > { %3996 = vmatprep.subr.bf16.mxu0 %v4318_v28  ;;  %3854 = vmatprep.mubr.bf16.mxu1 %v4319_v29 }
  0x9b   : > { %3982 = vmatprep.mubr.bf16.mxu0 %v4320_v30 }
  0x9c   : > { %4031 = vmatpush3.bf16.msra.mxu1 %v4318_v28 }
  0x9d   : > { %3997 = vmatpush3.bf16.msra.mxu0 %v4318_v28  ;;  %4024 = vmatprep.subr.bf16.mxu1 %v4323_v40 }
  0x9e   : > { %3998 = vmatprep.subr.bf16.mxu0 %v4323_v40 }
  0x9f   : > { %3855 = vmatmul.mubr.bf16.gmra.mrb[12].mxu1 %v4321_v43 }
  0xa0   : > { %3983 = vmatmul.mubr.bf16.gmra.mrb[12].mxu0 %v4322_v47  ;;  %4032 = vmatpush3.bf16.msra.mxu1 %v4323_v40 }
  0xa1   : > { %3999 = vmatpush3.bf16.msra.mxu0 %v4323_v40  ;;  %4025 = vmatprep.subr.bf16.mxu1 %v4324_v52 }
  0xa2   : > { %4000 = vmatprep.subr.bf16.mxu0 %v4324_v52  ;;  %4002 = vmatprep.mubr.bf16.mxu0 %v2630_v58 }
  0xa3   : > { %4010 = vmatprep.mubr.bf16.mxu1 %v2662_v60 }
  0xa4   : > { %4033 = vmatpush3.bf16.msra.mxu1 %v4324_v52 }
  0xa5   : > { %4001 = vmatpush3.bf16.msra.mxu0 %v4324_v52 }
  0xa7   : > { %4011 = vmatmul.mubr.bf16.vlgmr.msra.gmra.mrb[16].mxu1 %v2670_v5 }
  0xa8   : > { %4003 = vmatmul.mubr.bf16.vlgmr.msra.gmra.mrb[0].mxu0 %v2638_v8  ;;  %4014 = vmatprep.mubr.bf16.mxu1 %v2678_v9 }
  0xa9   : > { %4006 = vmatprep.mubr.bf16.mxu0 %v2646_v11 }
  0xaf   : > { %4015 = vmatmul.mubr.bf16.gmra.mrb[20].mxu1 %v2686_v15 }
  0xb0   : > { %4007 = vmatmul.mubr.bf16.gmra.mrb[4].mxu0 %v2654_v16 }
 0x15a   : > { %v3844_v17 = vpop.f32.mrb[0].mxu1 }
 0x15b   : > { %v1262_v18 = vpop.f32.mrb[1].mxu1 }
 0x15c   : > { %v3845_v19 = vpop.f32.mrb[2].mxu1 }
 0x15d   : > { %v1265_v20 = vpop.f32.mrb[3].mxu1 }
 0x162   : > { %v4728_v21 = vpop.f32.mrb[4].mxu1 }
 0x163   : > { %v4730_v22 = vpop.f32.mrb[5].mxu1 }
 0x164   : > { %v4732_v23 = vpop.f32.mrb[6].mxu1 }
 0x165   : > { %v4734_v24 = vpop.f32.mrb[7].mxu1 }
 0x16a   : > { %v3852_v25 = vpop.f32.mrb[8].mxu1 }
 0x16b   : > { %v3980_v26 = vpop.f32.mrb[8].mxu0  ;;  %v1294_v27 = vpop.f32.mrb[9].mxu1 }
 0x16c   : > { %v4042_v28 = vadd.f32 %v3980_v26, %v3852_v25  ;;  %v2463_v29 = vpop.f32.mrb[9].mxu0  ;;  %v3853_v30 = vpop.f32.mrb[10].mxu1 }
 0x16d   : > { %v4044_v31 = vadd.f32 %v2463_v29, %v1294_v27  ;;  %v3981_v32 = vpop.f32.mrb[10].mxu0  ;;  %v1297_v33 = vpop.f32.mrb[11].mxu1 }
 0x16e   : > { %v4046_v34 = vadd.f32 %v3981_v32, %v3853_v30  ;;  %v2466_v35 = vpop.f32.mrb[11].mxu0 }
 0x16f   : > { %v4048_v36 = vadd.f32 %v2466_v35, %v1297_v33 }
 0x172   : > { %v3856_v37 = vpop.f32.mrb[12].mxu1 }
 0x173   : > { %v3984_v38 = vpop.f32.mrb[12].mxu0  ;;  %v1310_v39 = vpop.f32.mrb[13].mxu1 }
 0x174   : > { %v4050_v40 = vadd.f32 %v3984_v38, %v3856_v37  ;;  %v2479_v41 = vpop.f32.mrb[13].mxu0  ;;  %v3857_v42 = vpop.f32.mrb[14].mxu1 }
 0x175   : > { %v4052_v43 = vadd.f32 %v2479_v41, %v1310_v39  ;;  %v3985_v44 = vpop.f32.mrb[14].mxu0  ;;  %v1313_v45 = vpop.f32.mrb[15].mxu1 }
 0x176   : > { %v4736_v46 = vadd.f32 %v3985_v44, %v3857_v42  ;;  %v2482_v47 = vpop.f32.mrb[15].mxu0 }
 0x177   : > { %v4738_v48 = vadd.f32 %v2482_v47, %v1313_v45 }
 0x17a   : > { %v4012_v50 = vpop.f32.mrb[16].mxu1 }
 0x17b   : > { %v4004_v51 = vpop.f32.mrb[0].mxu0  ;;  %v4043_v52 = vadd.f32 %v4042_v28, %v4012_v50  ;;  %v2809_v53 = vpop.f32.mrb[17].mxu1 }
 0x17c   : > { %v4034_v54 = vadd.f32 %v4004_v51, %v3844_v17  ;;  %v2777_v56 = vpop.f32.mrb[1].mxu0  ;;  %v4045_v57 = vadd.f32 %v4044_v31, %v2809_v53  ;;  %v4013_v58 = vpop.f32.mrb[18].mxu1 }
 0x17d   : > { %v2921_v59 = vmul.f32 %v4043_v52, %v4743_v49  ;;  %v4035_v60 = vadd.f32 %v2777_v56, %v1262_v18  ;;  %v4005_v61 = vpop.f32.mrb[2].mxu0  ;;  %v4047_v62 = vadd.f32 %v4046_v34, %v4013_v58  ;;  %v2812_v63 = vpop.f32.mrb[19].mxu1 }
 0x17e   : > { %v2913_v0 = vmul.f32 %v4034_v54, %v4743_v49  ;;  %v2919_v1 = vmul.f32 %v4045_v57, %v4743_v49  ;;  %v4036_v2 = vadd.f32 %v4005_v61, %v3845_v19  ;;  %v2780_v3 = vpop.f32.mrb[3].mxu0  ;;  %v4049_v4 = vadd.f32 %v4048_v36, %v2812_v63 }
 0x17f   : > { %v2944_v5 = vadd.f32 %v4748_v55, %v2921_v59  ;;  %v2911_v6 = vmul.f32 %v4035_v60, %v4743_v49  ;;  %v2922_v7 = vmul.f32 %v4047_v62, %v4743_v49  ;;  %v4037_v8 = vadd.f32 %v2780_v3, %v1265_v20 }
 0x180   : > { %v2936_v9 = vadd.f32 %v4748_v55, %v2913_v0  ;;  %v2942_v10 = vadd.f32 %v4748_v55, %v2919_v1  ;;  %v2914_v11 = vmul.f32 %v4036_v2, %v4743_v49  ;;  %v2920_v12 = vmul.f32 %v4049_v4, %v4743_v49 }
 0x181   : > { %v2934_v13 = vadd.f32 %v4748_v55, %v2911_v6  ;;  %v2945_v14 = vadd.f32 %v4748_v55, %v2922_v7  ;;  %v2912_v15 = vmul.f32 %v4037_v8, %v4743_v49  ;;  %v2960_v17 = vmax.f32 %v2944_v5, 0.0 }
 0x182   : > { %v2952_v16 = vmax.f32 %v2936_v9, 0.0  ;;  %v2937_v18 = vadd.f32 %v4748_v55, %v2914_v11  ;;  %v2943_v19 = vadd.f32 %v4748_v55, %v2920_v12  ;;  %v4016_v20 = vpop.f32.mrb[20].mxu1  ;;  %v2958_v25 = vmax.f32 %v2942_v10, 0.0 }
 0x183   : > { %v2961_v26 = vmax.f32 %v2945_v14, 0.0  ;;  %v2935_v27 = vadd.f32 %v4748_v55, %v2912_v15  ;;  %v4008_v28 = vpop.f32.mrb[4].mxu0  ;;  %v4051_v29 = vadd.f32 %v4050_v40, %v4016_v20  ;;  %v2825_v30 = vpop.f32.mrb[21].mxu1  ;;  %v2950_v37 = vmax.f32 %v2934_v13, 0.0 }
 0x184   : > { %v2953_v31 = vmax.f32 %v2937_v18, 0.0  ;;  %v2959_v32 = vmax.f32 %v2943_v19, 0.0  ;;  %v4038_v33 = vadd.f32 %v4008_v28, %v4728_v21  ;;  %v2793_v34 = vpop.f32.mrb[5].mxu0  ;;  %v4053_v35 = vadd.f32 %v4052_v43, %v2825_v30  ;;  %v4017_v36 = vpop.f32.mrb[22].mxu1 }
 0x185   : > { %v3567_v38 = vpack.c.bf16 %v2961_v26, %v2960_v17  ;;  %v2951_v39 = vmax.f32 %v2935_v27, 0.0  ;;  %v4039_v40 = vadd.f32 %v2793_v34, %v4730_v22  ;;  %v4009_v41 = vpop.f32.mrb[6].mxu0  ;;  %v2828_v42 = vpop.f32.mrb[23].mxu1  ;;  %v2925_v50 = vmul.f32 %v4051_v29, %v4743_v49 }
 0x186   : > { %v3547_v44 = vpack.c.bf16 %v2953_v31, %v2952_v16  ;;  %v3562_v45 = vpack.c.bf16 %v2959_v32, %v2958_v25  ;;  %v2917_v47 = vmul.f32 %v4038_v33, %v4743_v49  ;;  %v2796_v21 = vpop.f32.mrb[7].mxu0  ;;  %v2923_v52 = vmul.f32 %v4053_v35, %v4743_v49 }
 0x187   : > { %3583 = vst [vmem:[%s4770_s24 + $0x28] sm:$0xff] %v3567_v38   ;;  %v3542_v43 = vpack.c.bf16 %v2951_v39, %v2950_v37  ;;  %v2915_v51 = vmul.f32 %v4039_v40, %v4743_v49  ;;  %v4040_v53 = vadd.f32 %v4009_v41, %v4732_v23  ;;  %v4055_v22 = vadd.f32 %v4736_v46, %v4017_v36 }
 0x188   : > { %3579 = vst [vmem:[%s4770_s24 + $0x8] sm:$0xff] %v3547_v44   ;;  %3582 = vst [vmem:[%s4770_s24 + $0x20] sm:$0xff] %v3562_v45   ;;  %v4041_v54 = vadd.f32 %v2796_v21, %v4734_v24  ;;  %v2940_v56 = vadd.f32 %v4748_v55, %v2917_v47  ;;  %v4057_v58 = vadd.f32 %v4738_v48, %v2828_v42 }
 0x189   : > { %3543 = vst [vmem:[%s4770_s24] sm:$0xff] %v3542_v43   ;;  %v2918_v57 = vmul.f32 %v4040_v53, %v4743_v49  ;;  %v2948_v59 = vadd.f32 %v4748_v55, %v2925_v50  ;;  %v2938_v60 = vadd.f32 %v4748_v55, %v2915_v51  ;;  %v2926_v61 = vmul.f32 %v4055_v22, %v4743_v49 }
 0x18a   : > { %v2916_v23 = vmul.f32 %v4041_v54, %v4743_v49  ;;  %v2946_v62 = vadd.f32 %v4748_v55, %v2923_v52  ;;  %v2924_v24 = vmul.f32 %v4057_v58, %v4743_v49  ;;  %v2956_v0 = vmax.f32 %v2940_v56, 0.0 }
 0x18b   : > { %v2941_v46 = vadd.f32 %v4748_v55, %v2918_v57  ;;  %v2949_v63 = vadd.f32 %v4748_v55, %v2926_v61  ;;  %v2964_v3 = vmax.f32 %v2948_v59, 0.0  ;;  %v2954_v4 = vmax.f32 %v2938_v60, 0.0 }
 0x18c   : > { %v2939_v48 = vadd.f32 %v4748_v55, %v2916_v23  ;;  %v2947_v2 = vadd.f32 %v4748_v55, %v2924_v24  ;;  %v2962_v7 = vmax.f32 %v2946_v62, 0.0 }
 0x18d   : > { %v2957_v1 = vmax.f32 %v2941_v46, 0.0  ;;  %v2965_v5 = vmax.f32 %v2949_v63, 0.0 }
 0x18e   : > { %v2955_v6 = vmax.f32 %v2939_v48, 0.0  ;;  %v2963_v9 = vmax.f32 %v2947_v2, 0.0 }
 0x18f   : > { %v3557_v8 = vpack.c.bf16 %v2957_v1, %v2956_v0  ;;  %v3577_v10 = vpack.c.bf16 %v2965_v5, %v2964_v3 }
 0x190   : > { %v3552_v49 = vpack.c.bf16 %v2955_v6, %v2954_v4  ;;  %v3572_v11 = vpack.c.bf16 %v2963_v9, %v2962_v7 }
 0x191   : > { %3581 = vst [vmem:[%s4770_s24 + $0x18] sm:$0xff] %v3557_v8   ;;  %3585 = vst [vmem:[%s4770_s24 + $0x38] sm:$0xff] %v3577_v10  }
 0x192   : > { %3580 = vst [vmem:[%s4770_s24 + $0x10] sm:$0xff] %v3552_v49   ;;  %3584 = vst [vmem:[%s4770_s24 + $0x30] sm:$0xff] %v3572_v11  }
 0x193 PF: > { %s14_s17 = sadd.s32 1, %s4356_s17   ;;  %s4816_s15 = smov %s4352_s16 }
 0x194   : > { %p11_p5 = scmp.ge.s32.totalorder %s14_s17, 4   ;;  %s4817_s16 = smov %s4819_s18 }
 0x196   :  { %13 = sbr.rel (!%p11_p5) target bundleno = 2 (0x2), region = 77 }

</bundles_post_ra>
